<compile_context>
chip_gen: v5e
topology: v5e:2x2
jax: 0.10.0
libtpu: 0.0.40
codegen_flags: <defaults>
</compile_context>

<pallas_src>
import math

import jax
import jax.numpy as jnp
import numpy as np
from jax.experimental import pallas as pl
from jax.experimental.pallas import tpu as pltpu

# ---------------- small config ----------------
B, S = 2, 8            # batch, seq_len
VOCAB = 50             # src_vocab_size
VOCAB_PAD = 128        # embedding table zero-padded to a full lane tile for the one-hot gather
E = 32                 # embed_size
D_OUT = 32             # d_out_n_heads
H = 2                  # num_heads
DH = D_OUT // H        # head_dim
FFN = 64               # ffn_hidden_dim
OUT_DIM = 28           # output_dim
NUM_LAYERS = 2
LN_EPS = 1e-5
N = B * S              # flattened rows
HN = H * N             # rows of the permuted per-head tensors (= B*H*S)
MAX_LEN = 512          # positional-encoding table length (>= S)

# ---------------- weight-slab row layout ([W_ROWS, 128] f32, one DMA) ----------------
W_EMB = 0                                   # [VOCAB_PAD, E]   (pre-scaled by sqrt(E))
W_LAYER_BASE = VOCAB_PAD                    # 128
W_LAYER_ROWS = 320
LW_Q0, LW_Q1, LW_K0, LW_K1, LW_V0, LW_V1 = 0, 32, 64, 96, 128, 160   # each [E, DH]
LW_O0, LW_O1 = 192, 208                     # wo split into [DH, E] halves
LW_W1, LW_W2 = 224, 256                     # [E, FFN], [FFN, E]
W_OUT_ROW = W_LAYER_BASE + NUM_LAYERS * W_LAYER_ROWS     # 768, [E, OUT_DIM]
W_SEL0 = W_OUT_ROW + 32                     # 800, [HN, N] selection (top block)
W_SEL1 = W_SEL0 + HN                        # 832, [HN, N] selection (bottom block)
W_SEL0T = W_SEL1 + HN                       # 864, [N, HN]
W_SEL1T = W_SEL0T + N                       # 880, [N, HN]
W_ROWS = W_SEL1T + N                        # 896

# ---------------- aux-slab row layout ([A_ROWS, 128] f32, one DMA) ----------------
A_PE = 0                                    # [N, E] positional encoding, tiled over batch
A_BLOCK = A_PE + N                          # 16  [HN, HN] static block-diagonal bias (0 / -1e30)
A_KEYPOS = A_BLOCK + HN                     # 48  [1, HN] in-group key position per column
A_KEYBAT = A_KEYPOS + 8                     # 56  [1, HN] batch index per column
A_SEQPOS = A_KEYBAT + 8                     # 64  [N, 1] sequence position per row
A_BATN = A_SEQPOS + N                       # 80  [N, 1] batch index per row
A_POOLSEQ = A_BATN + N                      # 96  [B, N] sequence position per pool column
A_POOLMATCH = A_POOLSEQ + 8                 # 104 [B, N] 1.0 where column batch == row
A_LAYER_BASE = A_POOLMATCH + 8              # 112
A_LAYER_ROWS = 56
LA_BO, LA_PG, LA_PB, LA_B1, LA_B2, LA_QG, LA_QB = 0, 8, 16, 24, 32, 40, 48
A_BOUT = A_LAYER_BASE + NUM_LAYERS * A_LAYER_ROWS        # 224, [1, OUT_DIM]
A_ROWS = A_BOUT + 8                                      # 232


def _ln(v, g, b):
    m = jnp.mean(v, axis=-1, keepdims=True)
    c = v - m
    var = jnp.mean(c * c, axis=-1, keepdims=True)
    return c * jax.lax.rsqrt(var + LN_EPS) * g + b


# ---------------- the fused Pallas kernel ----------------
def fused_forward_kernel(tokens_ref, len_ref, w_ref, a_ref, out_ref):
    f32 = jnp.float32
    lensf = [len_ref[b].astype(f32) for b in range(B)]

    def lengths_for(bat_table):
        # bat_table holds batch indices (as f32); return per-entry sequence lengths.
        out = jnp.zeros(bat_table.shape, f32)
        for b in range(B):
            out = jnp.where(bat_table == float(b), lensf[b], out)
        return out

    # ---- query / embedding mask [N, 1] (static tables + runtime lengths) ----
    seqpos_n = a_ref[A_SEQPOS:A_SEQPOS + N, 0:1]
    bat_n = a_ref[A_BATN:A_BATN + N, 0:1]
    maskq = (seqpos_n < lengths_for(bat_n)).astype(f32)

    # ---- attention bias: precomputed block-diagonal part + runtime key-padding row ----
    block_bias = a_ref[A_BLOCK:A_BLOCK + HN, 0:HN]
    keypos = a_ref[A_KEYPOS:A_KEYPOS + 1, 0:HN]
    keybat = a_ref[A_KEYBAT:A_KEYBAT + 1, 0:HN]
    pad_bias = jnp.where(keypos < lengths_for(keybat), 0.0, -1e30)      # [1, HN]
    attn_bias = block_bias + pad_bias                                   # [HN, HN]

    # ---- embedding gather (one-hot matmul; table pre-scaled by sqrt(E)) + PE + mask ----
    tok = tokens_ref[...]                                               # [N, 1] int32
    v_iota = jax.lax.broadcasted_iota(jnp.int32, (N, VOCAB_PAD), 1)
    onehot = (v_iota == tok).astype(f32)
    emb = jnp.dot(onehot, w_ref[W_EMB:W_EMB + VOCAB_PAD, 0:E], preferred_element_type=f32)
    x = (emb + a_ref[A_PE:A_PE + N, 0:E]) * maskq                       # [N, E]

    # ---- constant row-selection matrices (head split / un-split on the MXU) ----
    sel0 = w_ref[W_SEL0:W_SEL0 + HN, 0:N]
    sel1 = w_ref[W_SEL1:W_SEL1 + HN, 0:N]
    sel0t = w_ref[W_SEL0T:W_SEL0T + N, 0:HN]
    sel1t = w_ref[W_SEL1T:W_SEL1T + N, 0:HN]

    def mm(a_, b_):
        return jnp.dot(a_, b_, preferred_element_type=f32)

    for l in range(NUM_LAYERS):
        wb = W_LAYER_BASE + l * W_LAYER_ROWS
        ab = A_LAYER_BASE + l * A_LAYER_ROWS
        wq0 = w_ref[wb + LW_Q0:wb + LW_Q0 + E, 0:DH]
        wq1 = w_ref[wb + LW_Q1:wb + LW_Q1 + E, 0:DH]
        wk0 = w_ref[wb + LW_K0:wb + LW_K0 + E, 0:DH]
        wk1 = w_ref[wb + LW_K1:wb + LW_K1 + E, 0:DH]
        wv0 = w_ref[wb + LW_V0:wb + LW_V0 + E, 0:DH]
        wv1 = w_ref[wb + LW_V1:wb + LW_V1 + E, 0:DH]
        wo0 = w_ref[wb + LW_O0:wb + LW_O0 + DH, 0:E]
        wo1 = w_ref[wb + LW_O1:wb + LW_O1 + DH, 0:E]
        w1 = w_ref[wb + LW_W1:wb + LW_W1 + E, 0:FFN]
        w2 = w_ref[wb + LW_W2:wb + LW_W2 + FFN, 0:E]
        bo = a_ref[ab + LA_BO:ab + LA_BO + 1, 0:E]
        pg = a_ref[ab + LA_PG:ab + LA_PG + 1, 0:E]
        pb = a_ref[ab + LA_PB:ab + LA_PB + 1, 0:E]
        b1 = a_ref[ab + LA_B1:ab + LA_B1 + 1, 0:FFN]
        b2 = a_ref[ab + LA_B2:ab + LA_B2 + 1, 0:E]
        qg = a_ref[ab + LA_QG:ab + LA_QG + 1, 0:E]
        qb = a_ref[ab + LA_QB:ab + LA_QB + 1, 0:E]

        # permuted-row activations reproducing the module's .view(B,H,S,DH) split,
        # realized as MXU selection matmuls (no lane slices / sublane concats).
        x0 = mm(sel0, x)                                # [HN, E] = [x; 0]
        x1 = mm(sel1, x)                                # [HN, E] = [0; x]
        q_p = mm(x0, wq0) + mm(x1, wq1)                 # [HN, DH], already * 1/sqrt(d_k)
        k_p = mm(x0, wk0) + mm(x1, wk1)
        v_p = mm(x0, wv0) + mm(x1, wv1)

        sc = jax.lax.dot_general(q_p, k_p, (((1,), (1,)), ((), ())),
                                 preferred_element_type=f32) + attn_bias
        m = jnp.max(sc, axis=-1, keepdims=True)
        e = jnp.exp(sc - m)
        p_attn = e * pl.reciprocal(jnp.sum(e, axis=-1, keepdims=True), approx=True)
        ctx_p = mm(p_attn, v_p)                         # [HN, DH]

        # un-permute + out_proj fused: ctx @ wo == sel0t@(ctx_p@wo0) + sel1t@(ctx_p@wo1)
        out = mm(sel0t, mm(ctx_p, wo0)) + mm(sel1t, mm(ctx_p, wo1)) + bo
        out = out * maskq                               # query mask
        h1 = out + x                                    # MHA residual
        nx = _ln(h1, pg, pb)                            # pre_ffn_norm
        f = jnp.maximum(mm(nx, w1) + b1, 0.0)
        f = mm(f, w2) + b2
        f = f * maskq
        x = _ln(f + h1, qg, qb)                         # post_ffn_norm

    # ---- classification head + masked mean pool as one [B,N]@[N,OUT] matmul ----
    logits = mm(x, w_ref[W_OUT_ROW:W_OUT_ROW + E, 0:OUT_DIM]) \
        + a_ref[A_BOUT:A_BOUT + 1, 0:OUT_DIM]           # [N, OUT_DIM]
    pool_seq = a_ref[A_POOLSEQ:A_POOLSEQ + B, 0:N]
    pool_match = a_ref[A_POOLMATCH:A_POOLMATCH + B, 0:N]
    row_b = jax.lax.broadcasted_iota(jnp.int32, (B, 1), 0).astype(f32)
    len_b = lengths_for(row_b)                          # [B, 1]
    inv_len = pl.reciprocal(len_b, approx=True)
    pool = jnp.where(pool_seq < len_b, pool_match * inv_len, 0.0)       # [B, N]
    out_ref[...] = mm(pool, logits)                     # [B, OUT_DIM]


# ---------------- one-time host-side packing (outside jit) ----------------
def pack_params(params):
    f32 = np.float32
    w = np.zeros((W_ROWS, 128), f32)
    a = np.zeros((A_ROWS, 128), f32)

    # embedding pre-scaled by sqrt(E); padding_idx row 0 stays zero
    w[W_EMB:W_EMB + VOCAB, :E] = np.asarray(params["emb"], f32) * (E ** 0.5)

    inv_dk = 1.0 / math.sqrt(DH)
    for l in range(NUM_LAYERS):
        p = params["layers"][l]
        base = W_LAYER_BASE + l * W_LAYER_ROWS
        wq = np.asarray(p["wq"], f32) * inv_dk          # fold 1/sqrt(d_k) into Q projection
        wk = np.asarray(p["wk"], f32)
        wv = np.asarray(p["wv"], f32)
        wo = np.asarray(p["wo"], f32)
        w[base + LW_Q0:base + LW_Q0 + E, :DH] = wq[:, :DH]
        w[base + LW_Q1:base + LW_Q1 + E, :DH] = wq[:, DH:]
        w[base + LW_K0:base + LW_K0 + E, :DH] = wk[:, :DH]
        w[base + LW_K1:base + LW_K1 + E, :DH] = wk[:, DH:]
        w[base + LW_V0:base + LW_V0 + E, :DH] = wv[:, :DH]
        w[base + LW_V1:base + LW_V1 + E, :DH] = wv[:, DH:]
        w[base + LW_O0:base + LW_O0 + DH, :E] = wo[:DH, :]
        w[base + LW_O1:base + LW_O1 + DH, :E] = wo[DH:, :]
        w[base + LW_W1:base + LW_W1 + E, :FFN] = np.asarray(p["w1"], f32)
        w[base + LW_W2:base + LW_W2 + FFN, :E] = np.asarray(p["w2"], f32)

        ab = A_LAYER_BASE + l * A_LAYER_ROWS
        a[ab + LA_BO, :E] = np.asarray(p["bo"], f32).reshape(-1)
        a[ab + LA_PG, :E] = np.asarray(p["pre_g"], f32).reshape(-1)
        a[ab + LA_PB, :E] = np.asarray(p["pre_b"], f32).reshape(-1)
        a[ab + LA_B1, :FFN] = np.asarray(p["b1"], f32).reshape(-1)
        a[ab + LA_B2, :E] = np.asarray(p["b2"], f32).reshape(-1)
        a[ab + LA_QG, :E] = np.asarray(p["post_g"], f32).reshape(-1)
        a[ab + LA_QB, :E] = np.asarray(p["post_b"], f32).reshape(-1)

    w[W_OUT_ROW:W_OUT_ROW + E, :OUT_DIM] = np.asarray(params["w_out"], f32)
    a[A_BOUT, :OUT_DIM] = np.asarray(params["b_out"], f32).reshape(-1)

    # constant row-selection matrices for the head split / un-split
    eye = np.eye(N, dtype=f32)
    w[W_SEL0:W_SEL0 + N, :N] = eye               # Sel0  [HN,N]: picks rows 0..N-1
    w[W_SEL1 + N:W_SEL1 + HN, :N] = eye          # Sel1  [HN,N]: picks rows N..2N-1
    w[W_SEL0T:W_SEL0T + N, :N] = eye             # Sel0T [N,HN]
    w[W_SEL1T:W_SEL1T + N, N:HN] = eye           # Sel1T [N,HN]

    # positional encoding tiled to [N, E]
    pe = np.asarray(params["pe"], f32)[:S]
    a[A_PE:A_PE + N, :E] = np.tile(pe, (B, 1))

    # static attention-mask index tables for the module's non-standard .view head split:
    # permuted row m corresponds to view row pi(m) = (m % N)*H + m // N of the
    # .view(B, H, S, DH) tensor; group = pi // S, key position = pi % S, batch = group // H.
    idx = np.arange(HN)
    pi = (idx % N) * H + idx // N
    g = pi // S
    a[A_BLOCK:A_BLOCK + HN, :HN] = np.where(g[:, None] == g[None, :], 0.0, -1e30)
    a[A_KEYPOS, :HN] = (pi % S).astype(f32)
    a[A_KEYBAT, :HN] = (g // H).astype(f32)

    # static query-mask tables [N, 1]
    n_idx = np.arange(N)
    a[A_SEQPOS:A_SEQPOS + N, 0] = (n_idx % S).astype(f32)
    a[A_BATN:A_BATN + N, 0] = (n_idx // S).astype(f32)

    # static pooling tables [B, N]
    a[A_POOLSEQ:A_POOLSEQ + B, :N] = np.tile((n_idx % S).astype(f32), (B, 1))
    a[A_POOLMATCH:A_POOLMATCH + B, :N] = (n_idx[None, :] // S == np.arange(B)[:, None]).astype(f32)

    return jnp.asarray(w), jnp.asarray(a)


# ---------------- forward (single fused pallas_call; no per-call packing) ----------------
@jax.jit
def pallas_forward(tokens, lengths, slab_w, slab_a):
    tok2 = tokens.reshape(N, 1).astype(jnp.int32)
    lens = lengths.astype(jnp.int32)                   # [B] -> SMEM
    vmem = pl.BlockSpec(memory_space=pltpu.MemorySpace.VMEM)
    smem = pl.BlockSpec(memory_space=pltpu.MemorySpace.SMEM)
    return pl.pallas_call(
        fused_forward_kernel,
        out_shape=jax.ShapeDtypeStruct((B, OUT_DIM), jnp.float32),
        in_specs=[vmem, smem, vmem, vmem],
        out_specs=vmem,
    )(tok2, lens, slab_w, slab_a)


# ---------------- pure-JAX reference (mirrors PyTorch exactly) ----------------
def _ln_ref(v, g, b):
    m = jnp.mean(v, axis=-1, keepdims=True)
    c = v - m
    var = jnp.mean(c * c, axis=-1, keepdims=True)
    return c / jnp.sqrt(var + LN_EPS) * g + b


def reference_forward(tokens, lengths, params):
    emb = jnp.take(params["emb"], tokens, axis=0) * (E ** 0.5) + params["pe"][None, :S]
    mask = (jnp.arange(S)[None, :] < lengths[:, None]).astype(jnp.float32)   # [B, S]
    h = emb * mask[:, :, None]
    for l in range(NUM_LAYERS):
        p = params["layers"][l]
        q = (h @ p["wq"]).reshape(B, H, S, DH)
        k = (h @ p["wk"]).reshape(B, H, S, DH)
        v = (h @ p["wv"]).reshape(B, H, S, DH)
        sc = jnp.einsum("bhqd,bhkd->bhqk", q, k) / math.sqrt(DH)
        pad = mask < 0.5                                                     # padded keys
        sc = jnp.where(pad[:, None, None, :], -jnp.inf, sc)
        attn = jax.nn.softmax(sc, axis=-1)
        ctx = jnp.einsum("bhqk,bhkd->bhqd", attn, v).reshape(B, S, D_OUT)
        out = ctx @ p["wo"] + p["bo"]
        out = out * mask[:, :, None]
        h1 = out + h
        nx = _ln_ref(h1, p["pre_g"], p["pre_b"])
        f = jax.nn.relu(nx @ p["w1"] + p["b1"]) @ p["w2"] + p["b2"]
        f = f * mask[:, :, None]
        h = _ln_ref(f + h1, p["post_g"], p["post_b"])
    logits = h @ params["w_out"] + params["b_out"]
    logits = logits * mask[:, :, None]
    return logits.sum(axis=1) / lengths[:, None].astype(jnp.float32)


# ---------------- deterministic parameter init ----------------
def init_params(key):
    keys = jax.random.split(key, 64)
    it = iter(keys)

    def nrm(shape, scale):
        return (scale * jax.random.normal(next(it), shape)).astype(jnp.float32)

    emb = nrm((VOCAB, E), 0.1).at[0].set(0.0)    # padding_idx=0 row zeroed

    pos = jnp.arange(MAX_LEN, dtype=jnp.float32)[:, None]
    i = jnp.arange(0, E, 2, dtype=jnp.float32)
    denom = jnp.power(10000.0, i / E)
    ang = pos / denom
    pe = jnp.zeros((MAX_LEN, E), jnp.float32)
    pe = pe.at[:, 0::2].set(jnp.sin(ang)).at[:, 1::2].set(jnp.cos(ang))

    layers = []
    for _ in range(NUM_LAYERS):
        layers.append(dict(
            wq=nrm((E, D_OUT), 0.15), wk=nrm((E, D_OUT), 0.15), wv=nrm((E, D_OUT), 0.15),
            wo=nrm((D_OUT, E), 0.15), bo=nrm((1, E), 0.05),
            pre_g=1.0 + nrm((1, E), 0.05), pre_b=nrm((1, E), 0.05),
            w1=nrm((E, FFN), 0.15), b1=nrm((1, FFN), 0.05),
            w2=nrm((FFN, E), 0.15), b2=nrm((1, E), 0.05),
            post_g=1.0 + nrm((1, E), 0.05), post_b=nrm((1, E), 0.05),
        ))
    w_out = nrm((E, OUT_DIM), 0.15)
    b_out = nrm((1, OUT_DIM), 0.05)
    return dict(emb=emb, pe=pe, layers=layers, w_out=w_out, b_out=b_out)


if __name__ == "__main__":
    key = jax.random.PRNGKey(0)
    pkey, tkey = jax.random.split(key)
    params = init_params(pkey)

    tokens = jax.random.randint(tkey, (B, S), 1, VOCAB, dtype=jnp.int32)
    lengths = jnp.array([8, 5], dtype=jnp.int32)      # keep lengths >= 1 (len==0 NaNs, as in torch)
    valid = jnp.arange(S)[None, :] < lengths[:, None]
    tokens = jnp.where(valid, tokens, 0)              # pad tokens beyond length

    slab_w, slab_a = pack_params(params)              # one-time packing, outside jit

    out = jax.block_until_ready(pallas_forward(tokens, lengths, slab_w, slab_a))

    with jax.default_matmul_precision("highest"):
        ref = jax.block_until_ready(reference_forward(tokens, lengths, params))

    assert out.shape == (B, OUT_DIM)
    np.testing.assert_allclose(np.asarray(out), np.asarray(ref), rtol=2e-2, atol=5e-3)
    print("KERNEL_OK")
</pallas_src>

<mosaic_0001>
module attributes {stable_mosaic.version = 11 : i64} {
  func.func @fused_forward_kernel(%arg0: memref<16x1xi32, #tpu.memory_space<vmem>>, %arg1: memref<2xi32, #tpu.memory_space<smem>>, %arg2: memref<896x128xf32, #tpu.memory_space<vmem>>, %arg3: memref<232x128xf32, #tpu.memory_space<vmem>>, %arg4: memref<2x28xf32, #tpu.memory_space<vmem>>) attributes {dimension_semantics = [], scalar_prefetch = 0 : i64, scratch_operands = 0 : i64, tpu.core_type = #tpu.core_type<tc>} {
    %c0 = arith.constant 0 : index
    %0 = memref.load %arg1[%c0] : memref<2xi32, #tpu.memory_space<smem>>
    %1 = arith.sitofp %0 : i32 to f32
    %c1 = arith.constant 1 : index
    %2 = memref.load %arg1[%c1] : memref<2xi32, #tpu.memory_space<smem>>
    %3 = arith.sitofp %2 : i32 to f32
    %c64 = arith.constant 64 : index
    %c0_0 = arith.constant 0 : index
    %4 = vector.load %arg3[%c64, %c0_0] : memref<232x128xf32, #tpu.memory_space<vmem>>, vector<16x1xf32>
    %c80 = arith.constant 80 : index
    %c0_1 = arith.constant 0 : index
    %5 = vector.load %arg3[%c80, %c0_1] : memref<232x128xf32, #tpu.memory_space<vmem>>, vector<16x1xf32>
    %cst = arith.constant 0.000000e+00 : f32
    %6 = vector.broadcast %cst : f32 to vector<16x1xf32>
    %cst_2 = arith.constant 0.000000e+00 : f32
    %7 = vector.broadcast %cst_2 : f32 to vector<16x1xf32>
    %8 = arith.cmpf oeq, %5, %7 : vector<16x1xf32>
    %9 = vector.broadcast %1 : f32 to vector<16x1xf32>
    %10 = arith.select %8, %9, %6 : vector<16x1xi1>, vector<16x1xf32>
    %cst_3 = arith.constant 1.000000e+00 : f32
    %11 = vector.broadcast %cst_3 : f32 to vector<16x1xf32>
    %12 = arith.cmpf oeq, %5, %11 : vector<16x1xf32>
    %13 = vector.broadcast %3 : f32 to vector<16x1xf32>
    %14 = arith.select %12, %13, %10 : vector<16x1xi1>, vector<16x1xf32>
    %15 = arith.cmpf olt, %4, %14 : vector<16x1xf32>
    %16 = arith.extui %15 : vector<16x1xi1> to vector<16x1xi32>
    %17 = arith.sitofp %16 : vector<16x1xi32> to vector<16x1xf32>
    %c16 = arith.constant 16 : index
    %c0_4 = arith.constant 0 : index
    %18 = vector.load %arg3[%c16, %c0_4] : memref<232x128xf32, #tpu.memory_space<vmem>>, vector<32x32xf32>
    %c48 = arith.constant 48 : index
    %c0_5 = arith.constant 0 : index
    %19 = vector.load %arg3[%c48, %c0_5] : memref<232x128xf32, #tpu.memory_space<vmem>>, vector<1x32xf32>
    %c56 = arith.constant 56 : index
    %c0_6 = arith.constant 0 : index
    %20 = vector.load %arg3[%c56, %c0_6] : memref<232x128xf32, #tpu.memory_space<vmem>>, vector<1x32xf32>
    %cst_7 = arith.constant 0.000000e+00 : f32
    %21 = vector.broadcast %cst_7 : f32 to vector<1x32xf32>
    %cst_8 = arith.constant 0.000000e+00 : f32
    %22 = vector.broadcast %cst_8 : f32 to vector<1x32xf32>
    %23 = arith.cmpf oeq, %20, %22 : vector<1x32xf32>
    %24 = vector.broadcast %1 : f32 to vector<1x32xf32>
    %25 = arith.select %23, %24, %21 : vector<1x32xi1>, vector<1x32xf32>
    %cst_9 = arith.constant 1.000000e+00 : f32
    %26 = vector.broadcast %cst_9 : f32 to vector<1x32xf32>
    %27 = arith.cmpf oeq, %20, %26 : vector<1x32xf32>
    %28 = vector.broadcast %3 : f32 to vector<1x32xf32>
    %29 = arith.select %27, %28, %25 : vector<1x32xi1>, vector<1x32xf32>
    %30 = arith.cmpf olt, %19, %29 : vector<1x32xf32>
    %cst_10 = arith.constant 0.000000e+00 : f32
    %cst_11 = arith.constant -1.000000e+30 : f32
    %31 = vector.broadcast %cst_10 : f32 to vector<1x32xf32>
    %32 = vector.broadcast %cst_11 : f32 to vector<1x32xf32>
    %33 = arith.select %30, %31, %32 : vector<1x32xi1>, vector<1x32xf32>
    %34 = vector.broadcast %33 : vector<1x32xf32> to vector<32x32xf32>
    %35 = arith.addf %18, %34 : vector<32x32xf32>
    %c0_12 = arith.constant 0 : index
    %c0_13 = arith.constant 0 : index
    %36 = vector.load %arg0[%c0_12, %c0_13] : memref<16x1xi32, #tpu.memory_space<vmem>>, vector<16x1xi32>
    %37 = tpu.iota {dimensions = array<i32: 1>} : vector<16x128xi32>
    %38 = vector.broadcast %36 : vector<16x1xi32> to vector<16x128xi32>
    %39 = arith.cmpi eq, %37, %38 : vector<16x128xi32>
    %40 = arith.extui %39 : vector<16x128xi1> to vector<16x128xi32>
    %41 = arith.sitofp %40 : vector<16x128xi32> to vector<16x128xf32>
    %c0_14 = arith.constant 0 : index
    %c0_15 = arith.constant 0 : index
    %42 = vector.load %arg2[%c0_14, %c0_15] : memref<896x128xf32, #tpu.memory_space<vmem>>, vector<128x32xf32>
    %cst_16 = arith.constant dense<0.000000e+00> : vector<16x32xf32>
    %43 = tpu.matmul %41, %42, %cst_16 {dimension_numbers = #tpu.dot_dimension_numbers<[1], [0], [0], [1], [0, 0, 1, 1], [], []>} : vector<16x128xf32>, vector<128x32xf32>, vector<16x32xf32> -> vector<16x32xf32>
    %c0_17 = arith.constant 0 : index
    %c0_18 = arith.constant 0 : index
    %44 = vector.load %arg3[%c0_17, %c0_18] : memref<232x128xf32, #tpu.memory_space<vmem>>, vector<16x32xf32>
    %45 = arith.addf %43, %44 : vector<16x32xf32>
    %46 = vector.broadcast %17 : vector<16x1xf32> to vector<16x32xf32>
    %47 = arith.mulf %45, %46 : vector<16x32xf32>
    %c800 = arith.constant 800 : index
    %c0_19 = arith.constant 0 : index
    %48 = vector.load %arg2[%c800, %c0_19] : memref<896x128xf32, #tpu.memory_space<vmem>>, vector<32x16xf32>
    %c832 = arith.constant 832 : index
    %c0_20 = arith.constant 0 : index
    %49 = vector.load %arg2[%c832, %c0_20] : memref<896x128xf32, #tpu.memory_space<vmem>>, vector<32x16xf32>
    %c864 = arith.constant 864 : index
    %c0_21 = arith.constant 0 : index
    %50 = vector.load %arg2[%c864, %c0_21] : memref<896x128xf32, #tpu.memory_space<vmem>>, vector<16x32xf32>
    %c880 = arith.constant 880 : index
    %c0_22 = arith.constant 0 : index
    %51 = vector.load %arg2[%c880, %c0_22] : memref<896x128xf32, #tpu.memory_space<vmem>>, vector<16x32xf32>
    %c128 = arith.constant 128 : index
    %c0_23 = arith.constant 0 : index
    %52 = vector.load %arg2[%c128, %c0_23] : memref<896x128xf32, #tpu.memory_space<vmem>>, vector<32x16xf32>
    %c160 = arith.constant 160 : index
    %c0_24 = arith.constant 0 : index
    %53 = vector.load %arg2[%c160, %c0_24] : memref<896x128xf32, #tpu.memory_space<vmem>>, vector<32x16xf32>
    %c192 = arith.constant 192 : index
    %c0_25 = arith.constant 0 : index
    %54 = vector.load %arg2[%c192, %c0_25] : memref<896x128xf32, #tpu.memory_space<vmem>>, vector<32x16xf32>
    %c224 = arith.constant 224 : index
    %c0_26 = arith.constant 0 : index
    %55 = vector.load %arg2[%c224, %c0_26] : memref<896x128xf32, #tpu.memory_space<vmem>>, vector<32x16xf32>
    %c256 = arith.constant 256 : index
    %c0_27 = arith.constant 0 : index
    %56 = vector.load %arg2[%c256, %c0_27] : memref<896x128xf32, #tpu.memory_space<vmem>>, vector<32x16xf32>
    %c288 = arith.constant 288 : index
    %c0_28 = arith.constant 0 : index
    %57 = vector.load %arg2[%c288, %c0_28] : memref<896x128xf32, #tpu.memory_space<vmem>>, vector<32x16xf32>
    %c320 = arith.constant 320 : index
    %c0_29 = arith.constant 0 : index
    %58 = vector.load %arg2[%c320, %c0_29] : memref<896x128xf32, #tpu.memory_space<vmem>>, vector<16x32xf32>
    %c336 = arith.constant 336 : index
    %c0_30 = arith.constant 0 : index
    %59 = vector.load %arg2[%c336, %c0_30] : memref<896x128xf32, #tpu.memory_space<vmem>>, vector<16x32xf32>
    %c352 = arith.constant 352 : index
    %c0_31 = arith.constant 0 : index
    %60 = vector.load %arg2[%c352, %c0_31] : memref<896x128xf32, #tpu.memory_space<vmem>>, vector<32x64xf32>
    %c384 = arith.constant 384 : index
    %c0_32 = arith.constant 0 : index
    %61 = vector.load %arg2[%c384, %c0_32] : memref<896x128xf32, #tpu.memory_space<vmem>>, vector<64x32xf32>
    %c112 = arith.constant 112 : index
    %c0_33 = arith.constant 0 : index
    %62 = vector.load %arg3[%c112, %c0_33] : memref<232x128xf32, #tpu.memory_space<vmem>>, vector<1x32xf32>
    %c120 = arith.constant 120 : index
    %c0_34 = arith.constant 0 : index
    %63 = vector.load %arg3[%c120, %c0_34] : memref<232x128xf32, #tpu.memory_space<vmem>>, vector<1x32xf32>
    %c128_35 = arith.constant 128 : index
    %c0_36 = arith.constant 0 : index
    %64 = vector.load %arg3[%c128_35, %c0_36] : memref<232x128xf32, #tpu.memory_space<vmem>>, vector<1x32xf32>
    %c136 = arith.constant 136 : index
    %c0_37 = arith.constant 0 : index
    %65 = vector.load %arg3[%c136, %c0_37] : memref<232x128xf32, #tpu.memory_space<vmem>>, vector<1x64xf32>
    %c144 = arith.constant 144 : index
    %c0_38 = arith.constant 0 : index
    %66 = vector.load %arg3[%c144, %c0_38] : memref<232x128xf32, #tpu.memory_space<vmem>>, vector<1x32xf32>
    %c152 = arith.constant 152 : index
    %c0_39 = arith.constant 0 : index
    %67 = vector.load %arg3[%c152, %c0_39] : memref<232x128xf32, #tpu.memory_space<vmem>>, vector<1x32xf32>
    %c160_40 = arith.constant 160 : index
    %c0_41 = arith.constant 0 : index
    %68 = vector.load %arg3[%c160_40, %c0_41] : memref<232x128xf32, #tpu.memory_space<vmem>>, vector<1x32xf32>
    %cst_42 = arith.constant dense<0.000000e+00> : vector<32x32xf32>
    %69 = tpu.matmul %48, %47, %cst_42 {dimension_numbers = #tpu.dot_dimension_numbers<[1], [0], [0], [1], [0, 0, 1, 1], [], []>} : vector<32x16xf32>, vector<16x32xf32>, vector<32x32xf32> -> vector<32x32xf32>
    %cst_43 = arith.constant dense<0.000000e+00> : vector<32x32xf32>
    %70 = tpu.matmul %49, %47, %cst_43 {dimension_numbers = #tpu.dot_dimension_numbers<[1], [0], [0], [1], [0, 0, 1, 1], [], []>} : vector<32x16xf32>, vector<16x32xf32>, vector<32x32xf32> -> vector<32x32xf32>
    %cst_44 = arith.constant dense<0.000000e+00> : vector<32x16xf32>
    %71 = tpu.matmul %69, %52, %cst_44 {dimension_numbers = #tpu.dot_dimension_numbers<[1], [0], [0], [1], [0, 0, 1, 1], [], []>} : vector<32x32xf32>, vector<32x16xf32>, vector<32x16xf32> -> vector<32x16xf32>
    %cst_45 = arith.constant dense<0.000000e+00> : vector<32x16xf32>
    %72 = tpu.matmul %70, %53, %cst_45 {dimension_numbers = #tpu.dot_dimension_numbers<[1], [0], [0], [1], [0, 0, 1, 1], [], []>} : vector<32x32xf32>, vector<32x16xf32>, vector<32x16xf32> -> vector<32x16xf32>
    %73 = arith.addf %71, %72 : vector<32x16xf32>
    %cst_46 = arith.constant dense<0.000000e+00> : vector<32x16xf32>
    %74 = tpu.matmul %69, %54, %cst_46 {dimension_numbers = #tpu.dot_dimension_numbers<[1], [0], [0], [1], [0, 0, 1, 1], [], []>} : vector<32x32xf32>, vector<32x16xf32>, vector<32x16xf32> -> vector<32x16xf32>
    %cst_47 = arith.constant dense<0.000000e+00> : vector<32x16xf32>
    %75 = tpu.matmul %70, %55, %cst_47 {dimension_numbers = #tpu.dot_dimension_numbers<[1], [0], [0], [1], [0, 0, 1, 1], [], []>} : vector<32x32xf32>, vector<32x16xf32>, vector<32x16xf32> -> vector<32x16xf32>
    %76 = arith.addf %74, %75 : vector<32x16xf32>
    %cst_48 = arith.constant dense<0.000000e+00> : vector<32x16xf32>
    %77 = tpu.matmul %69, %56, %cst_48 {dimension_numbers = #tpu.dot_dimension_numbers<[1], [0], [0], [1], [0, 0, 1, 1], [], []>} : vector<32x32xf32>, vector<32x16xf32>, vector<32x16xf32> -> vector<32x16xf32>
    %cst_49 = arith.constant dense<0.000000e+00> : vector<32x16xf32>
    %78 = tpu.matmul %70, %57, %cst_49 {dimension_numbers = #tpu.dot_dimension_numbers<[1], [0], [0], [1], [0, 0, 1, 1], [], []>} : vector<32x32xf32>, vector<32x16xf32>, vector<32x16xf32> -> vector<32x16xf32>
    %79 = arith.addf %77, %78 : vector<32x16xf32>
    %cst_50 = arith.constant dense<0.000000e+00> : vector<32x32xf32>
    %80 = tpu.matmul %73, %76, %cst_50 {dimension_numbers = #tpu.dot_dimension_numbers<[1], [1], [0], [0], [0, 0, 1, 0], [], []>} : vector<32x16xf32>, vector<32x16xf32>, vector<32x32xf32> -> vector<32x32xf32>
    %81 = arith.addf %80, %35 : vector<32x32xf32>
    %cst_51 = arith.constant dense<0xFF800000> : vector<32xf32>
    %82 = vector.multi_reduction <maximumf>, %81, %cst_51 [1] : vector<32x32xf32> to vector<32xf32>
    %83 = vector.shape_cast %82 : vector<32xf32> to vector<32x1xf32>
    %84 = vector.broadcast %83 : vector<32x1xf32> to vector<32x32xf32>
    %85 = arith.subf %81, %84 : vector<32x32xf32>
    %86 = math.exp %85 : vector<32x32xf32>
    %cst_52 = arith.constant dense<0.000000e+00> : vector<32xf32>
    %87 = vector.multi_reduction <add>, %86, %cst_52 [1] : vector<32x32xf32> to vector<32xf32>
    %88 = vector.shape_cast %87 : vector<32xf32> to vector<32x1xf32>
    %89 = tpu.reciprocal %88 {approx = true} : vector<32x1xf32> -> vector<32x1xf32>
    %90 = vector.broadcast %89 : vector<32x1xf32> to vector<32x32xf32>
    %91 = arith.mulf %86, %90 : vector<32x32xf32>
    %cst_53 = arith.constant dense<0.000000e+00> : vector<32x16xf32>
    %92 = tpu.matmul %91, %79, %cst_53 {dimension_numbers = #tpu.dot_dimension_numbers<[1], [0], [0], [1], [0, 0, 1, 1], [], []>} : vector<32x32xf32>, vector<32x16xf32>, vector<32x16xf32> -> vector<32x16xf32>
    %cst_54 = arith.constant dense<0.000000e+00> : vector<32x32xf32>
    %93 = tpu.matmul %92, %58, %cst_54 {dimension_numbers = #tpu.dot_dimension_numbers<[1], [0], [0], [1], [0, 0, 1, 1], [], []>} : vector<32x16xf32>, vector<16x32xf32>, vector<32x32xf32> -> vector<32x32xf32>
    %cst_55 = arith.constant dense<0.000000e+00> : vector<16x32xf32>
    %94 = tpu.matmul %50, %93, %cst_55 {dimension_numbers = #tpu.dot_dimension_numbers<[1], [0], [0], [1], [0, 0, 1, 1], [], []>} : vector<16x32xf32>, vector<32x32xf32>, vector<16x32xf32> -> vector<16x32xf32>
    %cst_56 = arith.constant dense<0.000000e+00> : vector<32x32xf32>
    %95 = tpu.matmul %92, %59, %cst_56 {dimension_numbers = #tpu.dot_dimension_numbers<[1], [0], [0], [1], [0, 0, 1, 1], [], []>} : vector<32x16xf32>, vector<16x32xf32>, vector<32x32xf32> -> vector<32x32xf32>
    %cst_57 = arith.constant dense<0.000000e+00> : vector<16x32xf32>
    %96 = tpu.matmul %51, %95, %cst_57 {dimension_numbers = #tpu.dot_dimension_numbers<[1], [0], [0], [1], [0, 0, 1, 1], [], []>} : vector<16x32xf32>, vector<32x32xf32>, vector<16x32xf32> -> vector<16x32xf32>
    %97 = arith.addf %94, %96 : vector<16x32xf32>
    %98 = vector.broadcast %62 : vector<1x32xf32> to vector<16x32xf32>
    %99 = arith.addf %97, %98 : vector<16x32xf32>
    %100 = vector.broadcast %17 : vector<16x1xf32> to vector<16x32xf32>
    %101 = arith.mulf %99, %100 : vector<16x32xf32>
    %102 = arith.addf %101, %47 : vector<16x32xf32>
    %cst_58 = arith.constant dense<0.000000e+00> : vector<16xf32>
    %103 = vector.multi_reduction <add>, %102, %cst_58 [1] : vector<16x32xf32> to vector<16xf32>
    %104 = vector.shape_cast %103 : vector<16xf32> to vector<16x1xf32>
    %cst_59 = arith.constant 3.200000e+01 : f32
    %105 = vector.broadcast %cst_59 : f32 to vector<16x1xf32>
    %106 = arith.divf %104, %105 : vector<16x1xf32>
    %107 = vector.broadcast %106 : vector<16x1xf32> to vector<16x32xf32>
    %108 = arith.subf %102, %107 : vector<16x32xf32>
    %109 = arith.mulf %108, %108 : vector<16x32xf32>
    %cst_60 = arith.constant dense<0.000000e+00> : vector<16xf32>
    %110 = vector.multi_reduction <add>, %109, %cst_60 [1] : vector<16x32xf32> to vector<16xf32>
    %111 = vector.shape_cast %110 : vector<16xf32> to vector<16x1xf32>
    %cst_61 = arith.constant 3.200000e+01 : f32
    %112 = vector.broadcast %cst_61 : f32 to vector<16x1xf32>
    %113 = arith.divf %111, %112 : vector<16x1xf32>
    %cst_62 = arith.constant 9.99999974E-6 : f32
    %114 = vector.broadcast %cst_62 : f32 to vector<16x1xf32>
    %115 = arith.addf %113, %114 : vector<16x1xf32>
    %116 = math.rsqrt %115 : vector<16x1xf32>
    %117 = vector.broadcast %116 : vector<16x1xf32> to vector<16x32xf32>
    %118 = arith.mulf %108, %117 : vector<16x32xf32>
    %119 = vector.broadcast %63 : vector<1x32xf32> to vector<16x32xf32>
    %120 = arith.mulf %118, %119 : vector<16x32xf32>
    %121 = vector.broadcast %64 : vector<1x32xf32> to vector<16x32xf32>
    %122 = arith.addf %120, %121 : vector<16x32xf32>
    %cst_63 = arith.constant dense<0.000000e+00> : vector<16x64xf32>
    %123 = tpu.matmul %122, %60, %cst_63 {dimension_numbers = #tpu.dot_dimension_numbers<[1], [0], [0], [1], [0, 0, 1, 1], [], []>} : vector<16x32xf32>, vector<32x64xf32>, vector<16x64xf32> -> vector<16x64xf32>
    %124 = vector.broadcast %65 : vector<1x64xf32> to vector<16x64xf32>
    %125 = arith.addf %123, %124 : vector<16x64xf32>
    %cst_64 = arith.constant 0.000000e+00 : f32
    %126 = vector.broadcast %cst_64 : f32 to vector<16x64xf32>
    %127 = arith.maximumf %125, %126 : vector<16x64xf32>
    %cst_65 = arith.constant dense<0.000000e+00> : vector<16x32xf32>
    %128 = tpu.matmul %127, %61, %cst_65 {dimension_numbers = #tpu.dot_dimension_numbers<[1], [0], [0], [1], [0, 0, 1, 1], [], []>} : vector<16x64xf32>, vector<64x32xf32>, vector<16x32xf32> -> vector<16x32xf32>
    %129 = vector.broadcast %66 : vector<1x32xf32> to vector<16x32xf32>
    %130 = arith.addf %128, %129 : vector<16x32xf32>
    %131 = vector.broadcast %17 : vector<16x1xf32> to vector<16x32xf32>
    %132 = arith.mulf %130, %131 : vector<16x32xf32>
    %133 = arith.addf %132, %102 : vector<16x32xf32>
    %cst_66 = arith.constant dense<0.000000e+00> : vector<16xf32>
    %134 = vector.multi_reduction <add>, %133, %cst_66 [1] : vector<16x32xf32> to vector<16xf32>
    %135 = vector.shape_cast %134 : vector<16xf32> to vector<16x1xf32>
    %cst_67 = arith.constant 3.200000e+01 : f32
    %136 = vector.broadcast %cst_67 : f32 to vector<16x1xf32>
    %137 = arith.divf %135, %136 : vector<16x1xf32>
    %138 = vector.broadcast %137 : vector<16x1xf32> to vector<16x32xf32>
    %139 = arith.subf %133, %138 : vector<16x32xf32>
    %140 = arith.mulf %139, %139 : vector<16x32xf32>
    %cst_68 = arith.constant dense<0.000000e+00> : vector<16xf32>
    %141 = vector.multi_reduction <add>, %140, %cst_68 [1] : vector<16x32xf32> to vector<16xf32>
    %142 = vector.shape_cast %141 : vector<16xf32> to vector<16x1xf32>
    %cst_69 = arith.constant 3.200000e+01 : f32
    %143 = vector.broadcast %cst_69 : f32 to vector<16x1xf32>
    %144 = arith.divf %142, %143 : vector<16x1xf32>
    %cst_70 = arith.constant 9.99999974E-6 : f32
    %145 = vector.broadcast %cst_70 : f32 to vector<16x1xf32>
    %146 = arith.addf %144, %145 : vector<16x1xf32>
    %147 = math.rsqrt %146 : vector<16x1xf32>
    %148 = vector.broadcast %147 : vector<16x1xf32> to vector<16x32xf32>
    %149 = arith.mulf %139, %148 : vector<16x32xf32>
    %150 = vector.broadcast %67 : vector<1x32xf32> to vector<16x32xf32>
    %151 = arith.mulf %149, %150 : vector<16x32xf32>
    %152 = vector.broadcast %68 : vector<1x32xf32> to vector<16x32xf32>
    %153 = arith.addf %151, %152 : vector<16x32xf32>
    %c448 = arith.constant 448 : index
    %c0_71 = arith.constant 0 : index
    %154 = vector.load %arg2[%c448, %c0_71] : memref<896x128xf32, #tpu.memory_space<vmem>>, vector<32x16xf32>
    %c480 = arith.constant 480 : index
    %c0_72 = arith.constant 0 : index
    %155 = vector.load %arg2[%c480, %c0_72] : memref<896x128xf32, #tpu.memory_space<vmem>>, vector<32x16xf32>
    %c512 = arith.constant 512 : index
    %c0_73 = arith.constant 0 : index
    %156 = vector.load %arg2[%c512, %c0_73] : memref<896x128xf32, #tpu.memory_space<vmem>>, vector<32x16xf32>
    %c544 = arith.constant 544 : index
    %c0_74 = arith.constant 0 : index
    %157 = vector.load %arg2[%c544, %c0_74] : memref<896x128xf32, #tpu.memory_space<vmem>>, vector<32x16xf32>
    %c576 = arith.constant 576 : index
    %c0_75 = arith.constant 0 : index
    %158 = vector.load %arg2[%c576, %c0_75] : memref<896x128xf32, #tpu.memory_space<vmem>>, vector<32x16xf32>
    %c608 = arith.constant 608 : index
    %c0_76 = arith.constant 0 : index
    %159 = vector.load %arg2[%c608, %c0_76] : memref<896x128xf32, #tpu.memory_space<vmem>>, vector<32x16xf32>
    %c640 = arith.constant 640 : index
    %c0_77 = arith.constant 0 : index
    %160 = vector.load %arg2[%c640, %c0_77] : memref<896x128xf32, #tpu.memory_space<vmem>>, vector<16x32xf32>
    %c656 = arith.constant 656 : index
    %c0_78 = arith.constant 0 : index
    %161 = vector.load %arg2[%c656, %c0_78] : memref<896x128xf32, #tpu.memory_space<vmem>>, vector<16x32xf32>
    %c672 = arith.constant 672 : index
    %c0_79 = arith.constant 0 : index
    %162 = vector.load %arg2[%c672, %c0_79] : memref<896x128xf32, #tpu.memory_space<vmem>>, vector<32x64xf32>
    %c704 = arith.constant 704 : index
    %c0_80 = arith.constant 0 : index
    %163 = vector.load %arg2[%c704, %c0_80] : memref<896x128xf32, #tpu.memory_space<vmem>>, vector<64x32xf32>
    %c168 = arith.constant 168 : index
    %c0_81 = arith.constant 0 : index
    %164 = vector.load %arg3[%c168, %c0_81] : memref<232x128xf32, #tpu.memory_space<vmem>>, vector<1x32xf32>
    %c176 = arith.constant 176 : index
    %c0_82 = arith.constant 0 : index
    %165 = vector.load %arg3[%c176, %c0_82] : memref<232x128xf32, #tpu.memory_space<vmem>>, vector<1x32xf32>
    %c184 = arith.constant 184 : index
    %c0_83 = arith.constant 0 : index
    %166 = vector.load %arg3[%c184, %c0_83] : memref<232x128xf32, #tpu.memory_space<vmem>>, vector<1x32xf32>
    %c192_84 = arith.constant 192 : index
    %c0_85 = arith.constant 0 : index
    %167 = vector.load %arg3[%c192_84, %c0_85] : memref<232x128xf32, #tpu.memory_space<vmem>>, vector<1x64xf32>
    %c200 = arith.constant 200 : index
    %c0_86 = arith.constant 0 : index
    %168 = vector.load %arg3[%c200, %c0_86] : memref<232x128xf32, #tpu.memory_space<vmem>>, vector<1x32xf32>
    %c208 = arith.constant 208 : index
    %c0_87 = arith.constant 0 : index
    %169 = vector.load %arg3[%c208, %c0_87] : memref<232x128xf32, #tpu.memory_space<vmem>>, vector<1x32xf32>
    %c216 = arith.constant 216 : index
    %c0_88 = arith.constant 0 : index
    %170 = vector.load %arg3[%c216, %c0_88] : memref<232x128xf32, #tpu.memory_space<vmem>>, vector<1x32xf32>
    %cst_89 = arith.constant dense<0.000000e+00> : vector<32x32xf32>
    %171 = tpu.matmul %48, %153, %cst_89 {dimension_numbers = #tpu.dot_dimension_numbers<[1], [0], [0], [1], [0, 0, 1, 1], [], []>} : vector<32x16xf32>, vector<16x32xf32>, vector<32x32xf32> -> vector<32x32xf32>
    %cst_90 = arith.constant dense<0.000000e+00> : vector<32x32xf32>
    %172 = tpu.matmul %49, %153, %cst_90 {dimension_numbers = #tpu.dot_dimension_numbers<[1], [0], [0], [1], [0, 0, 1, 1], [], []>} : vector<32x16xf32>, vector<16x32xf32>, vector<32x32xf32> -> vector<32x32xf32>
    %cst_91 = arith.constant dense<0.000000e+00> : vector<32x16xf32>
    %173 = tpu.matmul %171, %154, %cst_91 {dimension_numbers = #tpu.dot_dimension_numbers<[1], [0], [0], [1], [0, 0, 1, 1], [], []>} : vector<32x32xf32>, vector<32x16xf32>, vector<32x16xf32> -> vector<32x16xf32>
    %cst_92 = arith.constant dense<0.000000e+00> : vector<32x16xf32>
    %174 = tpu.matmul %172, %155, %cst_92 {dimension_numbers = #tpu.dot_dimension_numbers<[1], [0], [0], [1], [0, 0, 1, 1], [], []>} : vector<32x32xf32>, vector<32x16xf32>, vector<32x16xf32> -> vector<32x16xf32>
    %175 = arith.addf %173, %174 : vector<32x16xf32>
    %cst_93 = arith.constant dense<0.000000e+00> : vector<32x16xf32>
    %176 = tpu.matmul %171, %156, %cst_93 {dimension_numbers = #tpu.dot_dimension_numbers<[1], [0], [0], [1], [0, 0, 1, 1], [], []>} : vector<32x32xf32>, vector<32x16xf32>, vector<32x16xf32> -> vector<32x16xf32>
    %cst_94 = arith.constant dense<0.000000e+00> : vector<32x16xf32>
    %177 = tpu.matmul %172, %157, %cst_94 {dimension_numbers = #tpu.dot_dimension_numbers<[1], [0], [0], [1], [0, 0, 1, 1], [], []>} : vector<32x32xf32>, vector<32x16xf32>, vector<32x16xf32> -> vector<32x16xf32>
    %178 = arith.addf %176, %177 : vector<32x16xf32>
    %cst_95 = arith.constant dense<0.000000e+00> : vector<32x16xf32>
    %179 = tpu.matmul %171, %158, %cst_95 {dimension_numbers = #tpu.dot_dimension_numbers<[1], [0], [0], [1], [0, 0, 1, 1], [], []>} : vector<32x32xf32>, vector<32x16xf32>, vector<32x16xf32> -> vector<32x16xf32>
    %cst_96 = arith.constant dense<0.000000e+00> : vector<32x16xf32>
    %180 = tpu.matmul %172, %159, %cst_96 {dimension_numbers = #tpu.dot_dimension_numbers<[1], [0], [0], [1], [0, 0, 1, 1], [], []>} : vector<32x32xf32>, vector<32x16xf32>, vector<32x16xf32> -> vector<32x16xf32>
    %181 = arith.addf %179, %180 : vector<32x16xf32>
    %cst_97 = arith.constant dense<0.000000e+00> : vector<32x32xf32>
    %182 = tpu.matmul %175, %178, %cst_97 {dimension_numbers = #tpu.dot_dimension_numbers<[1], [1], [0], [0], [0, 0, 1, 0], [], []>} : vector<32x16xf32>, vector<32x16xf32>, vector<32x32xf32> -> vector<32x32xf32>
    %183 = arith.addf %182, %35 : vector<32x32xf32>
    %cst_98 = arith.constant dense<0xFF800000> : vector<32xf32>
    %184 = vector.multi_reduction <maximumf>, %183, %cst_98 [1] : vector<32x32xf32> to vector<32xf32>
    %185 = vector.shape_cast %184 : vector<32xf32> to vector<32x1xf32>
    %186 = vector.broadcast %185 : vector<32x1xf32> to vector<32x32xf32>
    %187 = arith.subf %183, %186 : vector<32x32xf32>
    %188 = math.exp %187 : vector<32x32xf32>
    %cst_99 = arith.constant dense<0.000000e+00> : vector<32xf32>
    %189 = vector.multi_reduction <add>, %188, %cst_99 [1] : vector<32x32xf32> to vector<32xf32>
    %190 = vector.shape_cast %189 : vector<32xf32> to vector<32x1xf32>
    %191 = tpu.reciprocal %190 {approx = true} : vector<32x1xf32> -> vector<32x1xf32>
    %192 = vector.broadcast %191 : vector<32x1xf32> to vector<32x32xf32>
    %193 = arith.mulf %188, %192 : vector<32x32xf32>
    %cst_100 = arith.constant dense<0.000000e+00> : vector<32x16xf32>
    %194 = tpu.matmul %193, %181, %cst_100 {dimension_numbers = #tpu.dot_dimension_numbers<[1], [0], [0], [1], [0, 0, 1, 1], [], []>} : vector<32x32xf32>, vector<32x16xf32>, vector<32x16xf32> -> vector<32x16xf32>
    %cst_101 = arith.constant dense<0.000000e+00> : vector<32x32xf32>
    %195 = tpu.matmul %194, %160, %cst_101 {dimension_numbers = #tpu.dot_dimension_numbers<[1], [0], [0], [1], [0, 0, 1, 1], [], []>} : vector<32x16xf32>, vector<16x32xf32>, vector<32x32xf32> -> vector<32x32xf32>
    %cst_102 = arith.constant dense<0.000000e+00> : vector<16x32xf32>
    %196 = tpu.matmul %50, %195, %cst_102 {dimension_numbers = #tpu.dot_dimension_numbers<[1], [0], [0], [1], [0, 0, 1, 1], [], []>} : vector<16x32xf32>, vector<32x32xf32>, vector<16x32xf32> -> vector<16x32xf32>
    %cst_103 = arith.constant dense<0.000000e+00> : vector<32x32xf32>
    %197 = tpu.matmul %194, %161, %cst_103 {dimension_numbers = #tpu.dot_dimension_numbers<[1], [0], [0], [1], [0, 0, 1, 1], [], []>} : vector<32x16xf32>, vector<16x32xf32>, vector<32x32xf32> -> vector<32x32xf32>
    %cst_104 = arith.constant dense<0.000000e+00> : vector<16x32xf32>
    %198 = tpu.matmul %51, %197, %cst_104 {dimension_numbers = #tpu.dot_dimension_numbers<[1], [0], [0], [1], [0, 0, 1, 1], [], []>} : vector<16x32xf32>, vector<32x32xf32>, vector<16x32xf32> -> vector<16x32xf32>
    %199 = arith.addf %196, %198 : vector<16x32xf32>
    %200 = vector.broadcast %164 : vector<1x32xf32> to vector<16x32xf32>
    %201 = arith.addf %199, %200 : vector<16x32xf32>
    %202 = vector.broadcast %17 : vector<16x1xf32> to vector<16x32xf32>
    %203 = arith.mulf %201, %202 : vector<16x32xf32>
    %204 = arith.addf %203, %153 : vector<16x32xf32>
    %cst_105 = arith.constant dense<0.000000e+00> : vector<16xf32>
    %205 = vector.multi_reduction <add>, %204, %cst_105 [1] : vector<16x32xf32> to vector<16xf32>
    %206 = vector.shape_cast %205 : vector<16xf32> to vector<16x1xf32>
    %cst_106 = arith.constant 3.200000e+01 : f32
    %207 = vector.broadcast %cst_106 : f32 to vector<16x1xf32>
    %208 = arith.divf %206, %207 : vector<16x1xf32>
    %209 = vector.broadcast %208 : vector<16x1xf32> to vector<16x32xf32>
    %210 = arith.subf %204, %209 : vector<16x32xf32>
    %211 = arith.mulf %210, %210 : vector<16x32xf32>
    %cst_107 = arith.constant dense<0.000000e+00> : vector<16xf32>
    %212 = vector.multi_reduction <add>, %211, %cst_107 [1] : vector<16x32xf32> to vector<16xf32>
    %213 = vector.shape_cast %212 : vector<16xf32> to vector<16x1xf32>
    %cst_108 = arith.constant 3.200000e+01 : f32
    %214 = vector.broadcast %cst_108 : f32 to vector<16x1xf32>
    %215 = arith.divf %213, %214 : vector<16x1xf32>
    %cst_109 = arith.constant 9.99999974E-6 : f32
    %216 = vector.broadcast %cst_109 : f32 to vector<16x1xf32>
    %217 = arith.addf %215, %216 : vector<16x1xf32>
    %218 = math.rsqrt %217 : vector<16x1xf32>
    %219 = vector.broadcast %218 : vector<16x1xf32> to vector<16x32xf32>
    %220 = arith.mulf %210, %219 : vector<16x32xf32>
    %221 = vector.broadcast %165 : vector<1x32xf32> to vector<16x32xf32>
    %222 = arith.mulf %220, %221 : vector<16x32xf32>
    %223 = vector.broadcast %166 : vector<1x32xf32> to vector<16x32xf32>
    %224 = arith.addf %222, %223 : vector<16x32xf32>
    %cst_110 = arith.constant dense<0.000000e+00> : vector<16x64xf32>
    %225 = tpu.matmul %224, %162, %cst_110 {dimension_numbers = #tpu.dot_dimension_numbers<[1], [0], [0], [1], [0, 0, 1, 1], [], []>} : vector<16x32xf32>, vector<32x64xf32>, vector<16x64xf32> -> vector<16x64xf32>
    %226 = vector.broadcast %167 : vector<1x64xf32> to vector<16x64xf32>
    %227 = arith.addf %225, %226 : vector<16x64xf32>
    %cst_111 = arith.constant 0.000000e+00 : f32
    %228 = vector.broadcast %cst_111 : f32 to vector<16x64xf32>
    %229 = arith.maximumf %227, %228 : vector<16x64xf32>
    %cst_112 = arith.constant dense<0.000000e+00> : vector<16x32xf32>
    %230 = tpu.matmul %229, %163, %cst_112 {dimension_numbers = #tpu.dot_dimension_numbers<[1], [0], [0], [1], [0, 0, 1, 1], [], []>} : vector<16x64xf32>, vector<64x32xf32>, vector<16x32xf32> -> vector<16x32xf32>
    %231 = vector.broadcast %168 : vector<1x32xf32> to vector<16x32xf32>
    %232 = arith.addf %230, %231 : vector<16x32xf32>
    %233 = vector.broadcast %17 : vector<16x1xf32> to vector<16x32xf32>
    %234 = arith.mulf %232, %233 : vector<16x32xf32>
    %235 = arith.addf %234, %204 : vector<16x32xf32>
    %cst_113 = arith.constant dense<0.000000e+00> : vector<16xf32>
    %236 = vector.multi_reduction <add>, %235, %cst_113 [1] : vector<16x32xf32> to vector<16xf32>
    %237 = vector.shape_cast %236 : vector<16xf32> to vector<16x1xf32>
    %cst_114 = arith.constant 3.200000e+01 : f32
    %238 = vector.broadcast %cst_114 : f32 to vector<16x1xf32>
    %239 = arith.divf %237, %238 : vector<16x1xf32>
    %240 = vector.broadcast %239 : vector<16x1xf32> to vector<16x32xf32>
    %241 = arith.subf %235, %240 : vector<16x32xf32>
    %242 = arith.mulf %241, %241 : vector<16x32xf32>
    %cst_115 = arith.constant dense<0.000000e+00> : vector<16xf32>
    %243 = vector.multi_reduction <add>, %242, %cst_115 [1] : vector<16x32xf32> to vector<16xf32>
    %244 = vector.shape_cast %243 : vector<16xf32> to vector<16x1xf32>
    %cst_116 = arith.constant 3.200000e+01 : f32
    %245 = vector.broadcast %cst_116 : f32 to vector<16x1xf32>
    %246 = arith.divf %244, %245 : vector<16x1xf32>
    %cst_117 = arith.constant 9.99999974E-6 : f32
    %247 = vector.broadcast %cst_117 : f32 to vector<16x1xf32>
    %248 = arith.addf %246, %247 : vector<16x1xf32>
    %249 = math.rsqrt %248 : vector<16x1xf32>
    %250 = vector.broadcast %249 : vector<16x1xf32> to vector<16x32xf32>
    %251 = arith.mulf %241, %250 : vector<16x32xf32>
    %252 = vector.broadcast %169 : vector<1x32xf32> to vector<16x32xf32>
    %253 = arith.mulf %251, %252 : vector<16x32xf32>
    %254 = vector.broadcast %170 : vector<1x32xf32> to vector<16x32xf32>
    %255 = arith.addf %253, %254 : vector<16x32xf32>
    %c768 = arith.constant 768 : index
    %c0_118 = arith.constant 0 : index
    %256 = vector.load %arg2[%c768, %c0_118] : memref<896x128xf32, #tpu.memory_space<vmem>>, vector<32x28xf32>
    %cst_119 = arith.constant dense<0.000000e+00> : vector<16x28xf32>
    %257 = tpu.matmul %255, %256, %cst_119 {dimension_numbers = #tpu.dot_dimension_numbers<[1], [0], [0], [1], [0, 0, 1, 1], [], []>} : vector<16x32xf32>, vector<32x28xf32>, vector<16x28xf32> -> vector<16x28xf32>
    %c224_120 = arith.constant 224 : index
    %c0_121 = arith.constant 0 : index
    %258 = vector.load %arg3[%c224_120, %c0_121] : memref<232x128xf32, #tpu.memory_space<vmem>>, vector<1x28xf32>
    %259 = vector.broadcast %258 : vector<1x28xf32> to vector<16x28xf32>
    %260 = arith.addf %257, %259 : vector<16x28xf32>
    %c96 = arith.constant 96 : index
    %c0_122 = arith.constant 0 : index
    %261 = vector.load %arg3[%c96, %c0_122] : memref<232x128xf32, #tpu.memory_space<vmem>>, vector<2x16xf32>
    %c104 = arith.constant 104 : index
    %c0_123 = arith.constant 0 : index
    %262 = vector.load %arg3[%c104, %c0_123] : memref<232x128xf32, #tpu.memory_space<vmem>>, vector<2x16xf32>
    %263 = tpu.iota {dimensions = array<i32: 0>} : vector<2x1xi32>
    %264 = arith.sitofp %263 : vector<2x1xi32> to vector<2x1xf32>
    %cst_124 = arith.constant 0.000000e+00 : f32
    %265 = vector.broadcast %cst_124 : f32 to vector<2x1xf32>
    %cst_125 = arith.constant 0.000000e+00 : f32
    %266 = vector.broadcast %cst_125 : f32 to vector<2x1xf32>
    %267 = arith.cmpf oeq, %264, %266 : vector<2x1xf32>
    %268 = vector.broadcast %1 : f32 to vector<2x1xf32>
    %269 = arith.select %267, %268, %265 : vector<2x1xi1>, vector<2x1xf32>
    %cst_126 = arith.constant 1.000000e+00 : f32
    %270 = vector.broadcast %cst_126 : f32 to vector<2x1xf32>
    %271 = arith.cmpf oeq, %264, %270 : vector<2x1xf32>
    %272 = vector.broadcast %3 : f32 to vector<2x1xf32>
    %273 = arith.select %271, %272, %269 : vector<2x1xi1>, vector<2x1xf32>
    %274 = tpu.reciprocal %273 {approx = true} : vector<2x1xf32> -> vector<2x1xf32>
    %275 = vector.broadcast %273 : vector<2x1xf32> to vector<2x16xf32>
    %276 = arith.cmpf olt, %261, %275 : vector<2x16xf32>
    %277 = vector.broadcast %274 : vector<2x1xf32> to vector<2x16xf32>
    %278 = arith.mulf %262, %277 : vector<2x16xf32>
    %cst_127 = arith.constant 0.000000e+00 : f32
    %279 = vector.broadcast %cst_127 : f32 to vector<2x16xf32>
    %280 = arith.select %276, %278, %279 : vector<2x16xi1>, vector<2x16xf32>
    %cst_128 = arith.constant dense<0.000000e+00> : vector<2x28xf32>
    %281 = tpu.matmul %280, %260, %cst_128 {dimension_numbers = #tpu.dot_dimension_numbers<[1], [0], [0], [1], [0, 0, 1, 1], [], []>} : vector<2x16xf32>, vector<16x28xf32>, vector<2x28xf32> -> vector<2x28xf32>
    %c0_129 = arith.constant 0 : index
    %c0_130 = arith.constant 0 : index
    %282 = vector.load %arg4[%c0_129, %c0_130] : memref<2x28xf32, #tpu.memory_space<vmem>>, vector<2x28xf32>
    tpu.vector_store %arg4[%c0_129, %c0_130], %281 {strides = array<i32>} : memref<2x28xf32, #tpu.memory_space<vmem>>, vector<2x28xf32>,
    return
  }
}

</mosaic_0001>

<bundles_post_ra>
// kernel: pallas_forward.1
= control target key start
LH: loop header
LB: loop body
LE: loop exit
PB: predicated region body
PF: predicated region fallthrough
CT: control target
= control target key end

     0   :  { %9 = vsyncpa [#allocation5], 0  ;;  %s2464_s0 = inlined_call_operand.vmem [shape: s32[16,1], index: 0, kind: input, shape index: {}]   ;;  %s2465_s1 = inlined_call_operand.vmem [shape: s32[2], index: 1, kind: input, shape index: {}]   ;;  %s2466_s2 = inlined_call_operand.hbm [shape: f32[896,128], index: 2, kind: input, shape index: {}]   ;;  %s2467_s3 = inlined_call_operand.hbm [shape: f32[232,128], index: 3, kind: input, shape index: {}]   ;;  %s2468_s4 = inlined_call_operand.hbm [shape: f32[2,28], index: 4, kind: output, shape index: {}]  }
   0x1   :  { %10 = vsyncpa [#allocation3], 0 }
   0x2   :  { %11 = vsyncpa [#allocation8], 0 }
   0x3   :  { %12 = vsyncpa [#allocation4], 0  ;;  %s20_s17 = sshll.u32 %s2465_s1, 4  ;;  %s28_s20 = sshll.u32 %s2466_s2, 4  ;;  %s21_s17 = int_to_ptr.vmem [resolvable:$true] %s20_s17  ;;  %s29_s20 = int_to_ptr.hbm [resolvable:$true] %s28_s20 }
   0x4   :  { %s2090_s21 = smov [#allocation2]   ;;  %s2091_s22 = smov [#allocation6]  }
   0x5   :  { %23 = dma.vmem_to_smem %s21_s17, 16, %s2090_s21, [#allocation5]  }
   0x6   :  { %s30_s23 = sshll.u32 %s2091_s22, 4  ;;  %s2092_s24 = smov 128   ;;  %s31_s23 = int_to_ptr.vmem [resolvable:$true] %s30_s23 }
   0x7   :  { %s2093_s25 = smov 8   ;;  %s41_s28 = sshll.u32 %s2467_s3, 4  ;;  %s42_s28 = int_to_ptr.hbm [resolvable:$true] %s41_s28 }
   0x8   :  { %36 = dma.hbm_to_vmem [thread:$0]  %s29_s20, 14336, %s31_s23, [#allocation3], %s2092_s24, %s2092_s24, %s2093_s25  }
   0x9   :  { %s2094_s1 = smov [#allocation7]  }
   0xa   :  { %s43_s29 = sshll.u32 %s2094_s1, 4  ;;  %s44_s29 = int_to_ptr.vmem [resolvable:$true] %s43_s29 }
   0xb   :  { %49 = dma.hbm_to_vmem [thread:$0]  %s42_s28, 3712, %s44_s29, [#allocation8], %s2092_s24, %s2092_s24, %s2093_s25  }
   0xc   :  { %2082 = dma.done.wait [#allocation5], 16  }
   0xd   :  { %2083 = vsyncadd [#allocation5], 4294967280 }
   0xe   :  { %2084 = dma.done.wait [#allocation3], 14336  }
   0xf   :  { %2085 = vsyncadd [#allocation3], 4294952960 }
  0x10   :  { %2086 = dma.done.wait [#allocation8], 3712  }
  0x11   :  { %2087 = vsyncadd [#allocation8], 4294963584 }
  0x12   :  { %62 = sfence }
  0x13   :  { %v104_v0 = vld [vmem:[%s2464_s0] sm:$0xff]  ;;  %v135_v1 = vld [vmem:[#allocation6 + $0x78] sm:$0xff]  ;;  %v2095_v2 = vmov 0   ;;  %v134_v3 = vld [vmem:[#allocation6 + $0x70] sm:$0xff]  ;;  %v106_v18 = vlaneseq  ;;  %s1783_s7 = sld [smem:[#allocation2 + $0x1]]  ;;  %v2096_v34 = vmov 0.0  }
  0x14   :  { %1924 = vset.pattern.permute.xlu0 %v2095_v2  ;;  %138 = vmatpush.msra.mxu0 %v135_v1  ;;  %v133_v4 = vld [vmem:[#allocation6 + $0x68] sm:$0xff]  ;;  %v132_v5 = vld [vmem:[#allocation6 + $0x60] sm:$0xff]  ;;  %v131_v7 = vld [vmem:[#allocation6 + $0x58] sm:$0xff]  ;;  %v2097_v40 = vmov 1.0   ;;  %vm232_vm9 = vcmask 130048   ;;  %vm315_vm10 = vcmask 261120  }
  0x15   :  { %109 = vperm.xlu0 %1924, %v104_v0   ;;  %1925 = vset.pattern.permute.xlu1 %v2095_v2  ;;  %v105_v6 = vld [vmem:[%s2464_s0 + $0x8] sm:$0xff]  ;;  %v130_v8 = vld [vmem:[#allocation6 + $0x50] sm:$0xff]  ;;  %v128_v10 = vld [vmem:[#allocation6 + $0x40] sm:$0xff]  ;;  %s63_s0 = sld [smem:[#allocation2]]  ;;  %v2141_v19 = vshrl.u32 %v106_v18, 7  ;;  %v107_v38 = vand.u32 127, %v106_v18 }
  0x16   :  { %139 = vmatpush.msra.mxu0 %v134_v3  ;;  %v129_v9 = vld [vmem:[#allocation6 + $0x48] sm:$0xff]  ;;  %v127_v11 = vld [vmem:[#allocation6 + $0x38] sm:$0xff]  ;;  %v126_v12 = vld [vmem:[#allocation6 + $0x30] sm:$0xff]  ;;  %s2100_s9 = smov [#allocation9]   ;;  %s1771_s13 = sshll.u32 %s2468_s4, 4  ;;  %s1772_s13 = int_to_ptr.hbm [resolvable:$true] %s1771_s13 }
  0x17   :  { %v125_v13 = vld [vmem:[#allocation6 + $0x28] sm:$0xff]  ;;  %v124_v14 = vld [vmem:[#allocation6 + $0x20] sm:$0xff]  ;;  %v123_v15 = vld [vmem:[#allocation6 + $0x18] sm:$0xff]  ;;  %v1730_v20 = vcvt.s32.f32 %v2141_v19  ;;  %s1769_s10 = sshll.u32 %s2100_s9, 4  ;;  %s1770_s10 = int_to_ptr.vmem [resolvable:$true] %s1769_s10 }
  0x18   :  { %140 = vmatpush.msra.mxu0 %v133_v4  ;;  %v122_v16 = vld [vmem:[#allocation6 + $0x10] sm:$0xff]  ;;  %v121_v17 = vld [vmem:[#allocation6 + $0x8] sm:$0xff]  ;;  %v120_v23 = vld [vmem:[#allocation6] sm:$0xff] }
  0x19   :  { %vm2146_vm0 = vcmp.eq.f32.partialorder %v1730_v20, 0.0  ;;  %s66_s8 = scvt.s32.f32 %s1783_s7  ;;  %v69_v25 = vld [vmem:[#allocation7 + $0x50] sm:$0xff]  ;;  %v70_v26 = vld [vmem:[#allocation7 + $0x58] sm:$0xff]  ;;  %v67_v29 = vld [vmem:[#allocation7 + $0x40] sm:$0xff] }
  0x1a   :  { %141 = vmatpush.msra.mxu0 %v132_v5  ;;  %vm71_vm1 = vcmp.eq.f32.partialorder %v69_v25, 0.0  ;;  %vm72_vm2 = vcmp.eq.f32.partialorder %v70_v26, 0.0  ;;  %vm76_vm3 = vcmp.eq.f32.partialorder %v69_v25, 1.0  ;;  %vm77_vm4 = vcmp.eq.f32.partialorder %v70_v26, 1.0  ;;  %v68_v30 = vld [vmem:[#allocation7 + $0x48] sm:$0xff]  ;;  %v136_v43 = vld [vmem:[#allocation7] sm:$0xff] }
  0x1b   :  { %s64_s6 = scvt.s32.f32 %s63_s0  ;;  %v2157_v31 = vstv %s66_s8  ;;  %v137_v45 = vld [vmem:[#allocation7 + $0x8] sm:$0xff]  ;;  %v2173_v53 = vld [vmem:[#allocation6 + $0x320] sm:$0xff]  ;;  %v188_v55 = vld [vmem:[#allocation6 + $0x98] sm:$0xff] }
  0x1c   :  { %142 = vmatpush.msra.mxu0 %v131_v7  ;;  %v2175_v54 = vld [vmem:[#allocation6 + $0x340] sm:$0xff]  ;;  %v187_v56 = vld [vmem:[#allocation6 + $0x90] sm:$0xff]  ;;  %v186_v57 = vld [vmem:[#allocation6 + $0x88] sm:$0xff] }
  0x1d   :  { %112 = vperm.xlu0 %1924, %v105_v6   ;;  %v2150_v22 = vstv %s64_s6  ;;  %v2183_v58 = vld [vmem:[#allocation6 + $0x328] sm:$0xff]  ;;  %v2191_v60 = vld [vmem:[#allocation6 + $0x330] sm:$0xff]  ;;  %v2199_v62 = vld [vmem:[#allocation6 + $0x338] sm:$0xff] }
  0x1e   :  { %143 = vmatpush.msra.mxu0 %v130_v8  ;;  %v1732_v24 = vsel %vm2146_vm0, %v2150_v22, 0.0  ;;  %v74_v27 = vsel %vm71_vm1, %v2150_v22, 0.0  ;;  %v75_v28 = vsel %vm72_vm2, %v2150_v22, 0.0  ;;  %v2185_v59 = vld [vmem:[#allocation6 + $0x348] sm:$0xff]  ;;  %v2193_v61 = vld [vmem:[#allocation6 + $0x350] sm:$0xff]  ;;  %v2201_v63 = vld [vmem:[#allocation6 + $0x358] sm:$0xff] }
  0x1f   :  { %v79_v32 = vsel %vm76_vm3, %v2157_v31, %v74_v27  ;;  %v80_v33 = vsel %vm77_vm4, %v2157_v31, %v75_v28  ;;  %v192_v0 = vld [vmem:[#allocation6 + $0xb8] sm:$0xff]  ;;  %v185_v1 = vld [vmem:[#allocation6 + $0x80] sm:$0xff]  ;;  %v191_v4 = vld [vmem:[#allocation6 + $0xb0] sm:$0xff]  ;;  %vm1762_vm0 = vcmask 222208  }
  0x20   :  { %144 = vmatpush.msra.mxu0 %v129_v9  ;;  %vm81_vm5 = vcmp.lt.f32.partialorder %v67_v29, %v79_v32  ;;  %vm82_vm6 = vcmp.lt.f32.partialorder %v68_v30, %v80_v33  ;;  %v200_v2 = vld [vmem:[#allocation6 + $0xf8] sm:$0xff]  ;;  %340 = vmatpush.msra.mxu3 %v192_v0  ;;  %v199_v5 = vld [vmem:[#allocation6 + $0xf0] sm:$0xff]  ;;  %v190_v7 = vld [vmem:[#allocation6 + $0xa8] sm:$0xff] }
  0x21   :  { %v1784_v35 = vsel %vm81_vm5, 1.0, %v2096_v34  ;;  %v1785_v36 = vsel %vm82_vm6, 1.0, %v2096_v34  ;;  %v208_v3 = vld [vmem:[#allocation6 + $0x138] sm:$0xff]  ;;  %v207_v6 = vld [vmem:[#allocation6 + $0x130] sm:$0xff]  ;;  %v198_v8 = vld [vmem:[#allocation6 + $0xe8] sm:$0xff]  ;;  %vm877_vm6 = vcmask 523264  }
  0x22   :  { %145 = vmatpush.msra.mxu0 %v128_v10  ;;  %v1926_v37 = vpack.i.bf16 %v1784_v35, %v1785_v36  ;;  %341 = vmatpush.msra.mxu3 %v191_v4  ;;  %v206_v9 = vld [vmem:[#allocation6 + $0x128] sm:$0xff]  ;;  %v189_v10 = vld [vmem:[#allocation6 + $0xa0] sm:$0xff] }
  0x23   :  { %v201_v18 = vld [vmem:[#allocation6 + $0x100] sm:$0xff]  ;;  %v194_v25 = vld [vmem:[#allocation6 + $0xc8] sm:$0xff] }
  0x24   :  { %146 = vmatpush.msra.mxu0 %v127_v11  ;;  %1927 = vperm.xlu1 %1925, %v1926_v37   ;;  %v197_v11 = vld [vmem:[#allocation6 + $0xe0] sm:$0xff] }
  0x25   :  { %342 = vmatpush.msra.mxu3 %v190_v7  ;;  %v193_v26 = vld [vmem:[#allocation6 + $0xc0] sm:$0xff] }
  0x26   :  { %147 = vmatpush.msra.mxu0 %v126_v12  ;;  %v205_v12 = vld [vmem:[#allocation6 + $0x120] sm:$0xff] }
  0x27   :  { %343 = vmatpush.msra.mxu3 %v189_v10 }
  0x28   :  { %148 = vmatpush.msra.mxu0 %v125_v13  ;;  %v204_v13 = vld [vmem:[#allocation6 + $0x118] sm:$0xff] }
  0x2a   :  { %149 = vmatpush.msra.mxu0 %v124_v14  ;;  %v203_v14 = vld [vmem:[#allocation6 + $0x110] sm:$0xff] }
  0x2c   :  { %150 = vmatpush.msra.mxu0 %v123_v15  ;;  %v202_v15 = vld [vmem:[#allocation6 + $0x108] sm:$0xff] }
  0x2e   :  { %151 = vmatpush.msra.mxu0 %v122_v16 }
  0x30   :  { %152 = vmatpush.msra.mxu0 %v121_v17  ;;  %v196_v17 = vld [vmem:[#allocation6 + $0xd8] sm:$0xff] }
  0x31   :  { %439 = vmatpush.msrb.mxu3 %v196_v17 }
  0x32   :  { %153 = vmatpush.msra.mxu0 %v120_v23  ;;  %v195_v23 = vld [vmem:[#allocation6 + $0xd0] sm:$0xff] }
  0x33   :  { %440 = vmatpush.msrb.mxu3 %v195_v23  ;;  %v92_v23 = vld [vmem:[#allocation7 + $0x38] sm:$0x1] }
  0x34   :  { %468 = vmatpush.msrb.mxu0 %v208_v3  ;;  %vm93_vm11 = vcmp.eq.f32.partialorder %v92_v23, 0.0  ;;  %vm95_vm12 = vcmp.eq.f32.partialorder %v92_v23, 1.0 }
  0x35   :  { %441 = vmatpush.msrb.mxu3 %v194_v25  ;;  %v94_v25 = vsel %vm93_vm11, %v2150_v22, 0.0 }
  0x36   :  { %469 = vmatpush.msrb.mxu0 %v207_v6 }
  0x37   :  { %442 = vmatpush.msrb.mxu3 %v193_v26  ;;  %v96_v26 = vsel %vm95_vm12, %v2157_v31, %v94_v25 }
  0x38   :  { %470 = vmatpush.msrb.mxu0 %v206_v9 }
  0x3a   :  { %471 = vmatpush.msrb.mxu0 %v205_v12 }
  0x87   :  { %v110_v39 = vpop.permute.xlu0 %109 }
  0x88   :  { %vm114_vm7 = vcmp.eq.s32.totalorder %v107_v38, %v110_v39 }
  0x89   :  { %1788 = vmatmul.msk.f32.vlgmr.msra.gmra.mxu0 %vm114_vm7, %v2097_v40 }
  0x8f   :  { %v113_v41 = vpop.permute.xlu0 %112 }
  0x90   :  { %vm115_vm8 = vcmp.eq.s32.totalorder %v107_v38, %v113_v41 }
  0x91   :  { %1789 = vmatmul.msk.f32.gmra.mxu0 %vm115_vm8, %v2097_v40 }
  0x96   :  { %v1928_v44 = vpop.permute.xlu1 %1927 }
  0x97   :  { %v2161_v46 = vunpack.i.l.bf16 %v1928_v44  ;;  %v2163_v49 = vunpack.i.h.bf16 %v1928_v44 }
 0x106   :  { %v155_v42 = vpop.f32.mrf.mxu0 }
 0x107   :  { %v156_v48 = vadd.f32 %v155_v42, %v136_v43 }
 0x109   :  { %v2171_v52 = vmul.f32 %v2163_v49, %v156_v48 }
 0x10e   :  { %v158_v47 = vpop.f32.mrf.mxu0 }
 0x10f   :  { %v159_v50 = vadd.f32 %v158_v47, %v137_v45 }
 0x111   :  { %v2166_v51 = vmul.f32 %v2161_v46, %v159_v50 }
 0x113   :  { %259 = vmatpush.msra.mxu1 %v2166_v51  ;;  %300 = vmatpush.msra.mxu2 %v2166_v51 }
 0x115   :  { %260 = vmatpush.msra.mxu1 %v2171_v52  ;;  %301 = vmatpush.msra.mxu2 %v2171_v52 }
 0x116   :  { %1790 = vmatmul.msk.f32.vlgmr.msra.gmra.mxu1 %vm232_vm9, %v2173_v53  ;;  %1794 = vmatmul.msk.f32.vlgmr.msra.gmra.mxu2 %vm232_vm9, %v2175_v54 }
 0x117   :  { %381 = vmatpush.msrb.mxu1 %v188_v55  ;;  %410 = vmatpush.msrb.mxu2 %v200_v2 }
 0x119   :  { %382 = vmatpush.msrb.mxu1 %v187_v56  ;;  %411 = vmatpush.msrb.mxu2 %v199_v5 }
 0x11b   :  { %383 = vmatpush.msrb.mxu1 %v186_v57  ;;  %412 = vmatpush.msrb.mxu2 %v198_v8 }
 0x11d   :  { %384 = vmatpush.msrb.mxu1 %v185_v1  ;;  %413 = vmatpush.msrb.mxu2 %v197_v11 }
 0x11e   :  { %1791 = vmatmul.msk.f32.gmra.mxu1 %vm232_vm9, %v2183_v58  ;;  %1795 = vmatmul.msk.f32.gmra.mxu2 %vm232_vm9, %v2185_v59 }
 0x11f   :  { %497 = vmatpush.msra.mxu1 %v204_v13 }
 0x121   :  { %498 = vmatpush.msra.mxu1 %v203_v14 }
 0x123   :  { %499 = vmatpush.msra.mxu1 %v202_v15 }
 0x125   :  { %500 = vmatpush.msra.mxu1 %v201_v18 }
 0x126   :  { %1792 = vmatmul.msk.f32.gmra.mxu1 %vm232_vm9, %v2191_v60  ;;  %1796 = vmatmul.msk.f32.gmra.mxu2 %vm232_vm9, %v2193_v61 }
 0x12e   :  { %1793 = vmatmul.msk.f32.gmra.mxu1 %vm232_vm9, %v2199_v62  ;;  %1797 = vmatmul.msk.f32.gmra.mxu2 %vm232_vm9, %v2201_v63 }
 0x193   :  { %v262_v16 = vpop.f32.mrf.mxu1 }
 0x194   :  { %1802 = vmatmul.msk.f32.vlgmr.msrb.gmra.mxu1 %vm315_vm10, %v262_v16 }
 0x199   :  { %v303_v27 = vpop.f32.mrf.mxu2 }
 0x19a   :  { %1798 = vmatmul.msk.f32.vlgmr.msra.gmra.mxu3 %vm315_vm10, %v303_v27  ;;  %1806 = vmatmul.msk.f32.vlgmr.msrb.gmra.mxu2 %vm315_vm10, %v303_v27 }
 0x19b   :  { %1814 = vmatmul.msk.f32.vlgmr.msrb.gmra.mxu0 %vm315_vm10, %v303_v27  ;;  %v265_v28 = vpop.f32.mrf.mxu1  ;;  %v91_v27 = vld [vmem:[#allocation7 + $0x30] sm:$0x1] }
 0x19c   :  { %1803 = vmatmul.msk.f32.gmra.mxu1 %vm315_vm10, %v265_v28  ;;  %vm97_vm13 = vcmp.lt.f32.partialorder %v91_v27, %v96_v26  ;;  %v210_v26 = vld [vmem:[#allocation6 + $0x148] sm:$0xff]  ;;  %v212_v27 = vld [vmem:[#allocation6 + $0x158] sm:$0xff] }
 0x19d   :  { %678 = vmatpush.msra.mxu0 %v210_v26  ;;  %707 = vmatpush.msrb.mxu1 %v212_v27 }
 0x1a1   :  { %v306_v29 = vpop.f32.mrf.mxu2 }
 0x1a2   :  { %1799 = vmatmul.msk.f32.gmra.mxu3 %vm315_vm10, %v306_v29  ;;  %1807 = vmatmul.msk.f32.gmra.mxu2 %vm315_vm10, %v306_v29 }
 0x1a3   :  { %1815 = vmatmul.msk.f32.gmra.mxu0 %vm315_vm10, %v306_v29  ;;  %v268_v30 = vpop.f32.mrf.mxu1 }
 0x1a4   :  { %1804 = vmatmul.msk.f32.gmra.mxu1 %vm315_vm10, %v268_v30 }
 0x1a9   :  { %v309_v32 = vpop.f32.mrf.mxu2 }
 0x1aa   :  { %1800 = vmatmul.msk.f32.gmra.mxu3 %vm315_vm10, %v309_v32  ;;  %1808 = vmatmul.msk.f32.gmra.mxu2 %vm315_vm10, %v309_v32 }
 0x1ab   :  { %1816 = vmatmul.msk.f32.gmra.mxu0 %vm315_vm10, %v309_v32  ;;  %v271_v33 = vpop.f32.mrf.mxu1  ;;  %v87_v32 = vld [vmem:[#allocation7 + $0x10] sm:$0xff] }
 0x1ac   :  { %1805 = vmatmul.msk.f32.gmra.mxu1 %vm315_vm10, %v271_v33 }
 0x1b1   :  { %v312_v34 = vpop.f32.mrf.mxu2 }
 0x1b2   :  { %1801 = vmatmul.msk.f32.gmra.mxu3 %vm315_vm10, %v312_v34  ;;  %1809 = vmatmul.msk.f32.gmra.mxu2 %vm315_vm10, %v312_v34 }
 0x1b3   :  { %1817 = vmatmul.msk.f32.gmra.mxu0 %vm315_vm10, %v312_v34 }
 0x1b4   :  { %1818 = vmatmul.msk.f32.vlgmr.msra.gmra.mxu1 %vm315_vm10, %v262_v16 }
 0x1ba   :  { %1810 = vmatmul.msk.f32.vlgmr.msrb.gmra.mxu3 %vm315_vm10, %v262_v16 }
 0x1bc   :  { %1819 = vmatmul.msk.f32.gmra.mxu1 %vm315_vm10, %v265_v28 }
 0x1c2   :  { %1811 = vmatmul.msk.f32.gmra.mxu3 %vm315_vm10, %v265_v28  ;;  %v2098_v28 = vmov -1e+30  }
 0x1c3   :  { %v98_v29 = vsel %vm97_vm13, 0.0, %v2098_v28 }
 0x1c4   :  { %1820 = vmatmul.msk.f32.gmra.mxu1 %vm315_vm10, %v268_v30 }
 0x1ca   :  { %1812 = vmatmul.msk.f32.gmra.mxu3 %vm315_vm10, %v268_v30  ;;  %v99_v30 = vperm.slane %v98_v29, 0 }
 0x1cc   :  { %1821 = vmatmul.msk.f32.gmra.mxu1 %vm315_vm10, %v271_v33 }
 0x1d2   :  { %1813 = vmatmul.msk.f32.gmra.mxu3 %vm315_vm10, %v271_v33  ;;  %v2241_v33 = vadd.f32 %v99_v30, %v87_v32 }
 0x211   :  { %v386_v35 = vpop.f32.mrf.mxu1 }
 0x218   :  { %v473_v41 = vpop.f32.mrf.mxu0 }
 0x219   :  { %v389_v36 = vpop.f32.mrf.mxu1 }
 0x21d   :  { %v345_v37 = vpop.f32.mrf.mxu3  ;;  %v415_v47 = vpop.f32.mrf.mxu2 }
 0x21e   :  { %v387_v15 = vadd.f32 %v386_v35, %v345_v37 }
 0x220   :  { %v476_v44 = vpop.f32.mrf.mxu0 }
 0x221   :  { %v392_v38 = vpop.f32.mrf.mxu1 }
 0x225   :  { %v348_v39 = vpop.f32.mrf.mxu3  ;;  %v418_v56 = vpop.f32.mrf.mxu2 }
 0x226   :  { %v390_v16 = vadd.f32 %v389_v36, %v348_v39  ;;  %v88_v36 = vld [vmem:[#allocation7 + $0x18] sm:$0xff] }
 0x228   :  { %v479_v55 = vpop.f32.mrf.mxu0 }
 0x229   :  { %v395_v40 = vpop.f32.mrf.mxu1 }
 0x22d   :  { %v351_v42 = vpop.f32.mrf.mxu3  ;;  %v421_v4 = vpop.f32.mrf.mxu2 }
 0x22e   :  { %v393_v17 = vadd.f32 %v392_v38, %v351_v42  ;;  %v2245_v38 = vadd.f32 %v99_v30, %v88_v36 }
 0x230   :  { %v482_v1 = vpop.f32.mrf.mxu0 }
 0x231   :  { %v502_v43 = vpop.f32.mrf.mxu1 }
 0x232   :  { %v503_v8 = vadd.f32 %v502_v43, %v473_v41  ;;  %v89_v41 = vld [vmem:[#allocation7 + $0x20] sm:$0xff] }
 0x233   :  { %v2249_v43 = vadd.f32 %v99_v30, %v89_v41 }
 0x235   :  { %v354_v45 = vpop.f32.mrf.mxu3  ;;  %v424_v9 = vpop.f32.mrf.mxu2 }
 0x236   :  { %v396_v18 = vadd.f32 %v395_v40, %v354_v45 }
 0x239   :  { %v505_v48 = vpop.f32.mrf.mxu1 }
 0x23a   :  { %v506_v7 = vadd.f32 %v505_v48, %v476_v44 }
 0x23d   :  { %v444_v50 = vpop.f32.mrf.mxu3 }
 0x23e   :  { %v445_v14 = vadd.f32 %v444_v50, %v415_v47  ;;  %v90_v47 = vld [vmem:[#allocation7 + $0x28] sm:$0xff] }
 0x23f   :  { %v2253_v50 = vadd.f32 %v99_v30, %v90_v47 }
 0x241   :  { %v508_v57 = vpop.f32.mrf.mxu1 }
 0x242   :  { %v509_v5 = vadd.f32 %v508_v57, %v479_v55 }
 0x245   :  { %v447_v0 = vpop.f32.mrf.mxu3 }
 0x246   :  { %v448_v13 = vadd.f32 %v447_v0, %v418_v56 }
 0x249   :  { %v511_v2 = vpop.f32.mrf.mxu1 }
 0x24a   :  { %v512_v3 = vadd.f32 %v511_v2, %v482_v1 }
 0x24c   :  { %635 = vmatpush.msra.mxu3 %v512_v3 }
 0x24d   :  { %v450_v6 = vpop.f32.mrf.mxu3 }
 0x24e   :  { %636 = vmatpush.msra.mxu3 %v509_v5  ;;  %v451_v12 = vadd.f32 %v450_v6, %v421_v4 }
 0x250   :  { %637 = vmatpush.msra.mxu3 %v506_v7 }
 0x252   :  { %638 = vmatpush.msra.mxu3 %v503_v8 }
 0x255   :  { %v453_v10 = vpop.f32.mrf.mxu3 }
 0x256   :  { %v454_v11 = vadd.f32 %v453_v10, %v424_v9 }
 0x258   :  { %1822 = vmatpush.xpose.msk.msra.mxu2 %vm232_vm9, %v454_v11 }
 0x25c   :  { %1823 = vmatpush.xpose.msk.msra.mxu2 %vm232_vm9, %v451_v12 }
 0x260   :  { %1824 = vmatpush.xpose.msk.msra.mxu2 %vm232_vm9, %v448_v13 }
 0x264   :  { %1825 = vmatpush.xpose.msk.msra.mxu2 %vm232_vm9, %v445_v14 }
 0x267   :  { %1826 = vmatmul.msk.f32.vlgmr.msra.gmra.mxu2 %vm232_vm9, %v387_v15 }
 0x26f   :  { %1827 = vmatmul.msk.f32.gmra.mxu2 %vm232_vm9, %v390_v16 }
 0x277   :  { %1828 = vmatmul.msk.f32.gmra.mxu2 %vm232_vm9, %v393_v17 }
 0x27f   :  { %1829 = vmatmul.msk.f32.gmra.mxu2 %vm232_vm9, %v396_v18 }
 0x2ea   :  { %v555_v34 = vpop.f32.mrf.mxu2 }
 0x2eb   :  { %v556_v35 = vadd.f32 %v555_v34, %v2241_v33 }
 0x2ed   :  { %v567_v37 = vsel %vm315_vm10, %v556_v35, -inf }
 0x2ee   :  { %568 = vmax.xlane.f32.xlu1 %v567_v37 }
 0x2f2   :  { %v558_v39 = vpop.f32.mrf.mxu2 }
 0x2f3   :  { %v559_v40 = vadd.f32 %v558_v39, %v2245_v38 }
 0x2f5   :  { %v570_v42 = vsel %vm315_vm10, %v559_v40, -inf }
 0x2f6   :  { %571 = vmax.xlane.f32.xlu2 %v570_v42  ;;  %v209_v42 = vld [vmem:[#allocation6 + $0x140] sm:$0xff] }
 0x2f7   :  { %679 = vmatpush.msra.mxu0 %v209_v42 }
 0x2fa   :  { %v561_v44 = vpop.f32.mrf.mxu2 }
 0x2fb   :  { %v562_v45 = vadd.f32 %v561_v44, %v2249_v43  ;;  %v211_v44 = vld [vmem:[#allocation6 + $0x150] sm:$0xff] }
 0x2fc   :  { %708 = vmatpush.msrb.mxu1 %v211_v44 }
 0x2fd   :  { %v573_v48 = vsel %vm315_vm10, %v562_v45, -inf }
 0x2fe   :  { %574 = vmax.xlane.f32.xlu2 %v573_v48 }
 0x302   :  { %v564_v55 = vpop.f32.mrf.mxu2 }
 0x303   :  { %v565_v56 = vadd.f32 %v564_v55, %v2253_v50 }
 0x305   :  { %v576_v57 = vsel %vm315_vm10, %v565_v56, -inf }
 0x306   :  { %577 = vmax.xlane.f32.xlu0 %v576_v57 }
 0x361   :  { %v569_v0 = vpop.xlane.xlu1 %568 }
 0x362   :  { %v579_v1 = vsub.f32 %v556_v35, %v569_v0 }
 0x364   :  { %v583_v2 = vmul.f32 1.442695, %v579_v1 }
 0x366   :  { %1946 = vpow2.f32 %v583_v2 }
 0x369   :  { %v572_v3 = vpop.xlane.xlu2 %571 }
 0x36a   :  { %v580_v4 = vsub.f32 %v559_v40, %v572_v3 }
 0x36c   :  { %v1947_v5 = vpop.eup %1946  ;;  %v585_v6 = vmul.f32 1.442695, %v580_v4 }
 0x36d   :  { %v591_v7 = vsel %vm315_vm10, %v1947_v5, 0.0 }
 0x36e   :  { %1948 = vpow2.f32 %v585_v6  ;;  %592 = vadd.xlane.f32.xlu2 %v591_v7  ;;  %v2273_v6 = vld [vmem:[#allocation6 + $0x370] sm:$0xff]  ;;  %v2275_v7 = vld [vmem:[#allocation6 + $0x360] sm:$0xff] }
 0x371   :  { %v575_v8 = vpop.xlane.xlu2 %574 }
 0x372   :  { %v581_v9 = vsub.f32 %v562_v45, %v575_v8  ;;  %v2281_v8 = vld [vmem:[#allocation6 + $0x378] sm:$0xff] }
 0x374   :  { %v1949_v10 = vpop.eup %1948  ;;  %v587_v11 = vmul.f32 1.442695, %v581_v9  ;;  %v2283_v9 = vld [vmem:[#allocation6 + $0x368] sm:$0xff] }
 0x375   :  { %v594_v12 = vsel %vm315_vm10, %v1949_v10, 0.0 }
 0x376   :  { %1950 = vpow2.f32 %v587_v11  ;;  %595 = vadd.xlane.f32.xlu2 %v594_v12 }
 0x379   :  { %v578_v13 = vpop.xlane.xlu0 %577 }
 0x37a   :  { %v582_v14 = vsub.f32 %v565_v56, %v578_v13 }
 0x37c   :  { %v1951_v15 = vpop.eup %1950  ;;  %v589_v16 = vmul.f32 1.442695, %v582_v14 }
 0x37d   :  { %v597_v17 = vsel %vm315_vm10, %v1951_v15, 0.0 }
 0x37e   :  { %1952 = vpow2.f32 %v589_v16  ;;  %598 = vadd.xlane.f32.xlu2 %v597_v17 }
 0x384   :  { %v1953_v18 = vpop.eup %1952 }
 0x385   :  { %v600_v23 = vsel %vm315_vm10, %v1953_v18, 0.0 }
 0x386   :  { %601 = vadd.xlane.f32.xlu2 %v600_v23 }
 0x3e1   :  { %v593_v25 = vpop.xlane.xlu2 %592 }
 0x3e2   :  { %1954 = vrcp.f32 %v593_v25 }
 0x3e8   :  { %v1955_v28 = vpop.eup %1954 }
 0x3e9   :  { %v607_v29 = vmul.f32 %v1955_v28, %v1947_v5  ;;  %v596_v30 = vpop.xlane.xlu2 %595 }
 0x3ea   :  { %1956 = vrcp.f32 %v596_v30  ;;  %v2099_v30 = vmov 32.0  }
 0x3eb   :  { %1830 = vmatmul.msk.f32.vlgmr.msra.gmra.mxu3 %vm315_vm10, %v607_v29 }
 0x3f0   :  { %v1957_v32 = vpop.eup %1956 }
 0x3f1   :  { %v599_v34 = vpop.xlane.xlu2 %598  ;;  %v608_v35 = vmul.f32 %v1957_v32, %v1949_v10  ;;  %v1931_v10 = vld [vmem:[#allocation7 + $0x70] ss:$0 sm:$0xff] }
 0x3f2   :  { %1958 = vrcp.f32 %v599_v34 }
 0x3f3   :  { %1831 = vmatmul.msk.f32.gmra.mxu3 %vm315_vm10, %v608_v35 }
 0x3f8   :  { %v1959_v36 = vpop.eup %1958 }
 0x3f9   :  { %v602_v37 = vpop.xlane.xlu2 %601  ;;  %v609_v39 = vmul.f32 %v1959_v36, %v1951_v15 }
 0x3fa   :  { %1960 = vrcp.f32 %v602_v37 }
 0x3fb   :  { %1832 = vmatmul.msk.f32.gmra.mxu3 %vm315_vm10, %v609_v39  ;;  %1962 = vrcp.f32 %v2099_v30 }
 0x400   :  { %v1961_v40 = vpop.eup %1960 }
 0x401   :  { %v610_v41 = vmul.f32 %v1961_v40, %v1953_v18 }
 0x403   :  { %1833 = vmatmul.msk.f32.gmra.mxu3 %vm315_vm10, %v610_v41 }
 0x46e   :  { %v640_v45 = vpop.f32.mrf.mxu3 }
 0x46f   :  { %1834 = vmatmul.msk.f32.vlgmr.msra.gmra.mxu0 %vm232_vm9, %v640_v45  ;;  %1838 = vmatmul.msk.f32.vlgmr.msrb.gmra.mxu1 %vm232_vm9, %v640_v45 }
 0x476   :  { %v643_v47 = vpop.f32.mrf.mxu3 }
 0x477   :  { %1835 = vmatmul.msk.f32.gmra.mxu0 %vm232_vm9, %v643_v47  ;;  %1839 = vmatmul.msk.f32.gmra.mxu1 %vm232_vm9, %v643_v47 }
 0x47e   :  { %v646_v48 = vpop.f32.mrf.mxu3 }
 0x47f   :  { %1836 = vmatmul.msk.f32.gmra.mxu0 %vm232_vm9, %v646_v48  ;;  %1840 = vmatmul.msk.f32.gmra.mxu1 %vm232_vm9, %v646_v48 }
 0x486   :  { %v649_v55 = vpop.f32.mrf.mxu3 }
 0x487   :  { %1837 = vmatmul.msk.f32.gmra.mxu0 %vm232_vm9, %v649_v55  ;;  %1841 = vmatmul.msk.f32.gmra.mxu1 %vm232_vm9, %v649_v55 }
 0x4ec   :  { %v681_v56 = vpop.f32.mrf.mxu0  ;;  %v710_v57 = vpop.f32.mrf.mxu1 }
 0x4f4   :  { %v684_v0 = vpop.f32.mrf.mxu0  ;;  %v713_v1 = vpop.f32.mrf.mxu1 }
 0x4fc   :  { %v687_v2 = vpop.f32.mrf.mxu0  ;;  %v716_v3 = vpop.f32.mrf.mxu1 }
 0x504   :  { %v690_v4 = vpop.f32.mrf.mxu0  ;;  %v719_v5 = vpop.f32.mrf.mxu1 }
 0x505   :  { %740 = vmatpush.msrb.mxu2 %v719_v5  ;;  %769 = vmatpush.msrb.mxu3 %v690_v4  ;;  %v224_v5 = vld [vmem:[#allocation6 + $0x1b8] sm:$0xff] }
 0x507   :  { %741 = vmatpush.msrb.mxu2 %v716_v3  ;;  %770 = vmatpush.msrb.mxu3 %v687_v2 }
 0x509   :  { %742 = vmatpush.msrb.mxu2 %v713_v1  ;;  %771 = vmatpush.msrb.mxu3 %v684_v0  ;;  %v214_v0 = vld [vmem:[#allocation6 + $0x168] sm:$0xff]  ;;  %v213_v1 = vld [vmem:[#allocation6 + $0x160] sm:$0xff] }
 0x50b   :  { %743 = vmatpush.msrb.mxu2 %v710_v57  ;;  %772 = vmatpush.msrb.mxu3 %v681_v56  ;;  %v216_v56 = vld [vmem:[#allocation6 + $0x178] sm:$0xff]  ;;  %v215_v57 = vld [vmem:[#allocation6 + $0x170] sm:$0xff] }
 0x50c   :  { %1842 = vmatmul.msk.f32.vlgmr.msrb.gmra.mxu2 %vm315_vm10, %v2273_v6  ;;  %1844 = vmatmul.msk.f32.vlgmr.msrb.gmra.mxu3 %vm315_vm10, %v2275_v7 }
 0x50d   :  { %863 = vmatpush.msrb.mxu0 %v216_v56  ;;  %892 = vmatpush.msra.mxu2 %v224_v5 }
 0x50f   :  { %864 = vmatpush.msrb.mxu0 %v215_v57 }
 0x511   :  { %865 = vmatpush.msrb.mxu0 %v214_v0  ;;  %v219_v0 = vld [vmem:[#allocation6 + $0x190] sm:$0xff] }
 0x513   :  { %866 = vmatpush.msrb.mxu0 %v213_v1  ;;  %v217_v1 = vld [vmem:[#allocation6 + $0x180] sm:$0xff] }
 0x514   :  { %1843 = vmatmul.msk.f32.gmra.mxu2 %vm315_vm10, %v2281_v8  ;;  %1845 = vmatmul.msk.f32.gmra.mxu3 %vm315_vm10, %v2283_v9 }
 0x58f   :  { %v745_v11 = vpop.f32.mrf.mxu2  ;;  %v774_v12 = vpop.f32.mrf.mxu3 }
 0x590   :  { %v775_v13 = vadd.f32 %v774_v12, %v745_v11  ;;  %v222_v11 = vld [vmem:[#allocation6 + $0x1a8] sm:$0xff] }
 0x592   :  { %v781_v14 = vadd.f32 %v1931_v10, %v775_v13 }
 0x594   :  { %v783_v15 = vmul.f32 %v2163_v49, %v781_v14  ;;  %v221_v14 = vld [vmem:[#allocation6 + $0x1a0] sm:$0xff] }
 0x596   :  { %v2291_v16 = vadd.f32 %v783_v15, %v2171_v52  ;;  %v1963_v52 = vpop.eup %1962 }
 0x597   :  { %v748_v17 = vpop.f32.mrf.mxu2  ;;  %v777_v18 = vpop.f32.mrf.mxu3  ;;  %v794_v32 = vmul.f32 32.0, %v1963_v52  ;;  %vm798_vm14 = vweird.f32 %v1963_v52 }
 0x598   :  { %v778_v23 = vadd.f32 %v777_v18, %v748_v17  ;;  %v787_v25 = vsel %vm315_vm10, %v2291_v16, 0.0  ;;  %v220_v18 = vld [vmem:[#allocation6 + $0x198] sm:$0xff] }
 0x599   :  { %788 = vadd.xlane.f32.xlu2 %v787_v25  ;;  %v795_v34 = vsub.f32 1.0, %v794_v32  ;;  %v1932_v32 = vld [vmem:[#allocation7 + $0x78] ss:$0 sm:$0xff] }
 0x59a   :  { %v782_v26 = vadd.f32 %v1931_v10, %v778_v23  ;;  %v223_v10 = vld [vmem:[#allocation6 + $0x1b0] sm:$0xff] }
 0x59b   :  { %v796_v35 = vmul.f32 %v1963_v52, %v795_v34  ;;  %893 = vmatpush.msra.mxu2 %v223_v10 }
 0x59c   :  { %v784_v27 = vmul.f32 %v2161_v46, %v782_v26 }
 0x59d   :  { %v797_v36 = vadd.f32 %v1963_v52, %v796_v35  ;;  %894 = vmatpush.msra.mxu2 %v222_v11 }
 0x59e   :  { %v2297_v28 = vadd.f32 %v784_v27, %v2166_v51 }
 0x59f   :  { %v2301_v37 = vsel %vm798_vm14, %v1963_v52, %v797_v36  ;;  %895 = vmatpush.msra.mxu2 %v221_v14 }
 0x5a0   :  { %v790_v29 = vsel %vm315_vm10, %v2297_v28, 0.0 }
 0x5a1   :  { %791 = vadd.xlane.f32.xlu1 %v790_v29  ;;  %896 = vmatpush.msra.mxu2 %v220_v18 }
 0x5a3   :  { %897 = vmatpush.msra.mxu2 %v219_v0 }
 0x60c   :  { %v789_v39 = vpop.xlane.xlu2 %788 }
 0x60d   :  { %v800_v40 = vmul.f32 %v2301_v37, %v789_v39  ;;  %v1933_v39 = vld [vmem:[#allocation7 + $0x80] ss:$0 sm:$0xff] }
 0x60f   :  { %v802_v51 = vsub.f32 %v2291_v16, %v800_v40 }
 0x611   :  { %v804_v41 = vmul.f32 %v802_v51, %v802_v51 }
 0x613   :  { %v806_v42 = vsel %vm315_vm10, %v804_v41, 0.0 }
 0x614   :  { %v792_v44 = vpop.xlane.xlu1 %791  ;;  %807 = vadd.xlane.f32.xlu2 %v806_v42 }
 0x615   :  { %v801_v45 = vmul.f32 %v2301_v37, %v792_v44 }
 0x617   :  { %v803_v47 = vsub.f32 %v2297_v28, %v801_v45 }
 0x619   :  { %v805_v48 = vmul.f32 %v803_v47, %v803_v47 }
 0x61b   :  { %v809_v55 = vsel %vm315_vm10, %v805_v48, 0.0 }
 0x61c   :  { %810 = vadd.xlane.f32.xlu0 %v809_v55 }
 0x687   :  { %v808_v2 = vpop.xlane.xlu2 %807 }
 0x688   :  { %v812_v3 = vmul.f32 %v808_v2, %v2301_v37  ;;  %v1934_v2 = vld [vmem:[#allocation7 + $0x88] ss:$0 sm:$0xff] }
 0x68a   :  { %v814_v4 = vadd.f32 1e-05, %v812_v3 }
 0x68c   :  { %1964 = vrsqrt.f32 %v814_v4  ;;  %vm822_vm1 = vweird.f32 %v814_v4 }
 0x68f   :  { %v811_v12 = vpop.xlane.xlu0 %810 }
 0x690   :  { %v813_v13 = vmul.f32 %v811_v12, %v2301_v37  ;;  %v1935_v12 = vld [vmem:[#allocation7 + $0x90] ss:$0 sm:$0xff] }
 0x692   :  { %v1965_v15 = vpop.eup %1964  ;;  %v815_v17 = vadd.f32 1e-05, %v813_v13 }
 0x693   :  { %v817_v23 = vmul.f32 %v1965_v15, %v814_v4  ;;  %vm823_vm15 = vweird.f32 %v1965_v15 }
 0x694   :  { %1966 = vrsqrt.f32 %v815_v17  ;;  %vm824_vm2 = vmor %vm822_vm1, %vm823_vm15  ;;  %vm832_vm4 = vweird.f32 %v815_v17 }
 0x695   :  { %v818_v25 = vmul.f32 %v1965_v15, %v817_v23 }
 0x697   :  { %v819_v26 = vmul.f32 0.5, %v818_v25 }
 0x699   :  { %v820_v27 = vsub.f32 1.5, %v819_v26 }
 0x69a   :  { %v1967_v29 = vpop.eup %1966 }
 0x69b   :  { %v821_v30 = vmul.f32 %v1965_v15, %v820_v27  ;;  %v827_v52 = vmul.f32 %v1967_v29, %v815_v17  ;;  %vm833_vm3 = vweird.f32 %v1967_v29 }
 0x69c   :  { %vm834_vm5 = vmor %vm832_vm4, %vm833_vm3 }
 0x69d   :  { %v825_v34 = vsel %vm824_vm2, %v1965_v15, %v821_v30  ;;  %v828_v35 = vmul.f32 %v1967_v29, %v827_v52 }
 0x69e   :  { %v836_v36 = vmul.f32 %v825_v34, %v802_v51  ;;  %v218_v51 = vld [vmem:[#allocation6 + $0x188] sm:$0xff] }
 0x69f   :  { %v829_v40 = vmul.f32 0.5, %v828_v35  ;;  %898 = vmatpush.msra.mxu2 %v218_v51 }
 0x6a0   :  { %v839_v41 = vmul.f32 %v1932_v32, %v836_v36 }
 0x6a1   :  { %v830_v42 = vsub.f32 1.5, %v829_v40  ;;  %899 = vmatpush.msra.mxu2 %v217_v1 }
 0x6a2   :  { %v842_v44 = vadd.f32 %v1933_v39, %v839_v41 }
 0x6a3   :  { %v831_v45 = vmul.f32 %v1967_v29, %v830_v42 }
 0x6a4   :  { %1846 = vmatmul.msk.f32.vlgmr.msrb.gmra.mxu0 %vm315_vm10, %v842_v44 }
 0x6a5   :  { %v835_v48 = vsel %vm834_vm5, %v1967_v29, %v831_v45 }
 0x6a6   :  { %v837_v55 = vmul.f32 %v835_v48, %v803_v47 }
 0x6a8   :  { %v840_v56 = vmul.f32 %v1932_v32, %v837_v55 }
 0x6aa   :  { %v843_v57 = vadd.f32 %v1933_v39, %v840_v56 }
 0x6ac   :  { %1847 = vmatmul.msk.f32.gmra.mxu0 %vm315_vm10, %v843_v57 }
 0x721   :  { %v868_v3 = vpop.f32.mrf.mxu0 }
 0x722   :  { %v869_v4 = vadd.f32 %v1934_v2, %v868_v3 }
 0x724   :  { %v874_v5 = vmax.f32 %v869_v4, 0.0 }
 0x726   :  { %1848 = vmatmul.msk.f32.vlgmr.msra.gmra.mxu2 %vm877_vm6, %v874_v5 }
 0x729   :  { %v871_v10 = vpop.f32.mrf.mxu0 }
 0x72a   :  { %v872_v11 = vadd.f32 %v1934_v2, %v871_v10 }
 0x72c   :  { %v875_v47 = vmax.f32 %v872_v11, 0.0 }
 0x72e   :  { %1849 = vmatmul.msk.f32.gmra.mxu2 %vm877_vm6, %v875_v47 }
 0x7a9   :  { %v901_v13 = vpop.f32.mrf.mxu2 }
 0x7aa   :  { %v902_v14 = vadd.f32 %v1935_v12, %v901_v13  ;;  %v1936_v13 = vld [vmem:[#allocation7 + $0x98] ss:$0 sm:$0xff] }
 0x7ac   :  { %v907_v15 = vmul.f32 %v2163_v49, %v902_v14 }
 0x7ae   :  { %v909_v17 = vadd.f32 %v907_v15, %v2291_v16 }
 0x7b0   :  { %v911_v18 = vsel %vm315_vm10, %v909_v17, 0.0 }
 0x7b1   :  { %v904_v23 = vpop.f32.mrf.mxu2  ;;  %912 = vadd.xlane.f32.xlu2 %v911_v18  ;;  %v968_v18 = vld [vmem:[#allocation6 + $0x1f8] sm:$0xff] }
 0x7b2   :  { %v905_v25 = vadd.f32 %v1935_v12, %v904_v23  ;;  %v967_v23 = vld [vmem:[#allocation6 + $0x1f0] sm:$0xff]  ;;  %1090 = vmatpush.msra.mxu1 %v968_v18 }
 0x7b4   :  { %v908_v26 = vmul.f32 %v2161_v46, %v905_v25  ;;  %1091 = vmatpush.msra.mxu1 %v967_v23 }
 0x7b6   :  { %v910_v27 = vadd.f32 %v908_v26, %v2297_v28  ;;  %v1937_v26 = vld [vmem:[#allocation7 + $0xa0] ss:$0 sm:$0xff] }
 0x7b8   :  { %v914_v29 = vsel %vm315_vm10, %v910_v27, 0.0 }
 0x7b9   :  { %915 = vadd.xlane.f32.xlu1 %v914_v29 }
 0x824   :  { %v913_v30 = vpop.xlane.xlu2 %912 }
 0x825   :  { %v917_v52 = vmul.f32 %v913_v30, %v2301_v37  ;;  %v966_v30 = vld [vmem:[#allocation6 + $0x1e8] sm:$0xff] }
 0x826   :  { %1092 = vmatpush.msra.mxu1 %v966_v30 }
 0x827   :  { %v919_v32 = vsub.f32 %v909_v17, %v917_v52 }
 0x829   :  { %v921_v34 = vmul.f32 %v919_v32, %v919_v32 }
 0x82b   :  { %v923_v35 = vsel %vm315_vm10, %v921_v34, 0.0  ;;  %v976_v34 = vld [vmem:[#allocation6 + $0x238] sm:$0xff] }
 0x82c   :  { %v916_v16 = vpop.xlane.xlu1 %915  ;;  %924 = vadd.xlane.f32.xlu1 %v923_v35  ;;  %v974_v35 = vld [vmem:[#allocation6 + $0x228] sm:$0xff] }
 0x82d   :  { %v918_v36 = vmul.f32 %v916_v16, %v2301_v37  ;;  %v973_v16 = vld [vmem:[#allocation6 + $0x220] sm:$0xff] }
 0x82f   :  { %v920_v39 = vsub.f32 %v910_v27, %v918_v36  ;;  %v963_v36 = vld [vmem:[#allocation6 + $0x1d0] sm:$0xff] }
 0x831   :  { %v922_v40 = vmul.f32 %v920_v39, %v920_v39 }
 0x833   :  { %v926_v41 = vsel %vm315_vm10, %v922_v40, 0.0  ;;  %v983_v40 = vld [vmem:[#allocation6 + $0x270] sm:$0xff] }
 0x834   :  { %927 = vadd.xlane.f32.xlu0 %v926_v41  ;;  %v982_v41 = vld [vmem:[#allocation6 + $0x268] sm:$0xff] }
 0x89f   :  { %v925_v28 = vpop.xlane.xlu1 %924 }
 0x8a0   :  { %v929_v42 = vmul.f32 %v925_v28, %v2301_v37  ;;  %v981_v28 = vld [vmem:[#allocation6 + $0x260] sm:$0xff] }
 0x8a2   :  { %v931_v44 = vadd.f32 1e-05, %v929_v42  ;;  %v980_v42 = vld [vmem:[#allocation6 + $0x258] sm:$0xff] }
 0x8a4   :  { %1968 = vrsqrt.f32 %v931_v44  ;;  %vm939_vm8 = vweird.f32 %v931_v44 }
 0x8a7   :  { %v928_v45 = vpop.xlane.xlu0 %927 }
 0x8a8   :  { %v930_v48 = vmul.f32 %v928_v45, %v2301_v37  ;;  %v979_v45 = vld [vmem:[#allocation6 + $0x250] sm:$0xff] }
 0x8aa   :  { %v1969_v55 = vpop.eup %1968  ;;  %v932_v56 = vadd.f32 1e-05, %v930_v48  ;;  %v978_v48 = vld [vmem:[#allocation6 + $0x248] sm:$0xff] }
 0x8ab   :  { %v934_v57 = vmul.f32 %v1969_v55, %v931_v44  ;;  %vm940_vm7 = vweird.f32 %v1969_v55 }
 0x8ac   :  { %1970 = vrsqrt.f32 %v932_v56  ;;  %vm941_vm11 = vmor %vm939_vm8, %vm940_vm7  ;;  %vm949_vm13 = vweird.f32 %v932_v56 }
 0x8ad   :  { %v935_v0 = vmul.f32 %v1969_v55, %v934_v57 }
 0x8af   :  { %v936_v51 = vmul.f32 0.5, %v935_v0 }
 0x8b1   :  { %v937_v1 = vsub.f32 1.5, %v936_v51 }
 0x8b2   :  { %v1971_v2 = vpop.eup %1970 }
 0x8b3   :  { %v944_v3 = vmul.f32 %v1971_v2, %v932_v56  ;;  %v938_v4 = vmul.f32 %v1969_v55, %v937_v1  ;;  %vm950_vm12 = vweird.f32 %v1971_v2 }
 0x8b4   :  { %vm951_vm14 = vmor %vm949_vm13, %vm950_vm12 }
 0x8b5   :  { %v945_v5 = vmul.f32 %v1971_v2, %v944_v3  ;;  %v942_v11 = vsel %vm941_vm11, %v1969_v55, %v938_v4  ;;  %v977_v55 = vld [vmem:[#allocation6 + $0x240] sm:$0xff] }
 0x8b6   :  { %v953_v14 = vmul.f32 %v942_v11, %v919_v32  ;;  %v975_v32 = vld [vmem:[#allocation6 + $0x230] sm:$0xff] }
 0x8b7   :  { %v946_v10 = vmul.f32 0.5, %v945_v5 }
 0x8b8   :  { %v956_v27 = vmul.f32 %v1936_v13, %v953_v14 }
 0x8b9   :  { %v947_v47 = vsub.f32 1.5, %v946_v10 }
 0x8ba   :  { %v2331_v52 = vadd.f32 %v1937_v26, %v956_v27 }
 0x8bb   :  { %v948_v12 = vmul.f32 %v1971_v2, %v947_v47 }
 0x8bd   :  { %v952_v15 = vsel %vm951_vm14, %v1971_v2, %v948_v12  ;;  %vm1733_vm14 = vcmp.eq.f32.partialorder %v1730_v20, 1.0 }
 0x8be   :  { %v954_v17 = vmul.f32 %v952_v15, %v920_v39  ;;  %v970_v39 = vld [vmem:[#allocation6 + $0x208] sm:$0xff] }
 0x8c0   :  { %v957_v25 = vmul.f32 %v1936_v13, %v954_v17 }
 0x8c2   :  { %v2327_v29 = vadd.f32 %v1937_v26, %v957_v25 }
 0x8c4   :  { %1022 = vmatpush.msra.mxu3 %v2327_v29  ;;  %1051 = vmatpush.msra.mxu0 %v2327_v29 }
 0x8c6   :  { %1023 = vmatpush.msra.mxu3 %v2331_v52  ;;  %1052 = vmatpush.msra.mxu0 %v2331_v52 }
 0x8c7   :  { %1850 = vmatmul.msk.f32.vlgmr.msra.gmra.mxu3 %vm232_vm9, %v2173_v53  ;;  %1854 = vmatmul.msk.f32.vlgmr.msra.gmra.mxu0 %vm232_vm9, %v2175_v54  ;;  %v965_v53 = vld [vmem:[#allocation6 + $0x1e0] sm:$0xff]  ;;  %v964_v54 = vld [vmem:[#allocation6 + $0x1d8] sm:$0xff] }
 0x8c8   :  { %1160 = vmatpush.msrb.mxu3 %v976_v34  ;;  %1093 = vmatpush.msra.mxu1 %v965_v53 }
 0x8c9   :  { %1131 = vmatpush.msrb.mxu2 %v964_v54 }
 0x8ca   :  { %1161 = vmatpush.msrb.mxu3 %v975_v32 }
 0x8cb   :  { %1132 = vmatpush.msrb.mxu2 %v963_v36 }
 0x8cc   :  { %1162 = vmatpush.msrb.mxu3 %v974_v35 }
 0x8ce   :  { %1163 = vmatpush.msrb.mxu3 %v973_v16 }
 0x8cf   :  { %1851 = vmatmul.msk.f32.gmra.mxu3 %vm232_vm9, %v2183_v58  ;;  %1855 = vmatmul.msk.f32.gmra.mxu0 %vm232_vm9, %v2185_v59  ;;  %v972_v58 = vld [vmem:[#allocation6 + $0x218] sm:$0xff]  ;;  %v971_v59 = vld [vmem:[#allocation6 + $0x210] sm:$0xff] }
 0x8d0   :  { %1189 = vmatpush.msrb.mxu0 %v972_v58 }
 0x8d2   :  { %1190 = vmatpush.msrb.mxu0 %v971_v59 }
 0x8d4   :  { %1191 = vmatpush.msrb.mxu0 %v970_v39 }
 0x8d7   :  { %1852 = vmatmul.msk.f32.gmra.mxu3 %vm232_vm9, %v2191_v60  ;;  %1856 = vmatmul.msk.f32.gmra.mxu0 %vm232_vm9, %v2193_v61  ;;  %v962_v60 = vld [vmem:[#allocation6 + $0x1c8] sm:$0xff]  ;;  %v961_v61 = vld [vmem:[#allocation6 + $0x1c0] sm:$0xff] }
 0x8d8   :  { %1133 = vmatpush.msrb.mxu2 %v962_v60 }
 0x8da   :  { %1134 = vmatpush.msrb.mxu2 %v961_v61 }
 0x8dc   :  { %1247 = vmatpush.msra.mxu2 %v980_v42 }
 0x8de   :  { %1248 = vmatpush.msra.mxu2 %v979_v45 }
 0x8df   :  { %1853 = vmatmul.msk.f32.gmra.mxu3 %vm232_vm9, %v2199_v62  ;;  %1857 = vmatmul.msk.f32.gmra.mxu0 %vm232_vm9, %v2201_v63  ;;  %v969_v62 = vld [vmem:[#allocation6 + $0x200] sm:$0xff]  ;;  %v984_v63 = vld [vmem:[#allocation6 + $0x278] sm:$0xff] }
 0x8e0   :  { %1192 = vmatpush.msrb.mxu0 %v969_v62  ;;  %1218 = vmatpush.msrb.mxu1 %v984_v63 }
 0x8e1   :  { %1249 = vmatpush.msra.mxu2 %v978_v48 }
 0x8e2   :  { %1219 = vmatpush.msrb.mxu1 %v983_v40 }
 0x8e3   :  { %1250 = vmatpush.msra.mxu2 %v977_v55 }
 0x8e4   :  { %1220 = vmatpush.msrb.mxu1 %v982_v41 }
 0x8e6   :  { %1221 = vmatpush.msrb.mxu1 %v981_v28 }
 0x944   :  { %v1054_v44 = vpop.f32.mrf.mxu0 }
 0x945   :  { %1858 = vmatmul.msk.f32.vlgmr.msra.gmra.mxu1 %vm315_vm10, %v1054_v44  ;;  %1866 = vmatmul.msk.f32.vlgmr.msrb.gmra.mxu3 %vm315_vm10, %v1054_v44 }
 0x94a   :  { %v1025_v56 = vpop.f32.mrf.mxu3 }
 0x94b   :  { %1862 = vmatmul.msk.f32.vlgmr.msrb.gmra.mxu2 %vm315_vm10, %v1025_v56  ;;  %1870 = vmatmul.msk.f32.vlgmr.msrb.gmra.mxu0 %vm315_vm10, %v1025_v56 }
 0x94c   :  { %v1057_v57 = vpop.f32.mrf.mxu0 }
 0x94d   :  { %1859 = vmatmul.msk.f32.gmra.mxu1 %vm315_vm10, %v1057_v57  ;;  %1867 = vmatmul.msk.f32.gmra.mxu3 %vm315_vm10, %v1057_v57 }
 0x952   :  { %v1028_v0 = vpop.f32.mrf.mxu3 }
 0x953   :  { %1863 = vmatmul.msk.f32.gmra.mxu2 %vm315_vm10, %v1028_v0  ;;  %1871 = vmatmul.msk.f32.gmra.mxu0 %vm315_vm10, %v1028_v0 }
 0x954   :  { %v1060_v51 = vpop.f32.mrf.mxu0 }
 0x955   :  { %1860 = vmatmul.msk.f32.gmra.mxu1 %vm315_vm10, %v1060_v51  ;;  %1868 = vmatmul.msk.f32.gmra.mxu3 %vm315_vm10, %v1060_v51 }
 0x95a   :  { %v1031_v1 = vpop.f32.mrf.mxu3 }
 0x95b   :  { %1864 = vmatmul.msk.f32.gmra.mxu2 %vm315_vm10, %v1031_v1  ;;  %1872 = vmatmul.msk.f32.gmra.mxu0 %vm315_vm10, %v1031_v1 }
 0x95c   :  { %v1063_v2 = vpop.f32.mrf.mxu0 }
 0x95d   :  { %1861 = vmatmul.msk.f32.gmra.mxu1 %vm315_vm10, %v1063_v2  ;;  %1869 = vmatmul.msk.f32.gmra.mxu3 %vm315_vm10, %v1063_v2 }
 0x962   :  { %v1034_v3 = vpop.f32.mrf.mxu3 }
 0x963   :  { %1865 = vmatmul.msk.f32.gmra.mxu2 %vm315_vm10, %v1034_v3  ;;  %1873 = vmatmul.msk.f32.gmra.mxu0 %vm315_vm10, %v1034_v3 }
 0x965   :  { %1874 = vmatmul.msk.f32.vlgmr.msrb.gmra.mxu1 %vm315_vm10, %v1054_v44 }
 0x96b   :  { %1878 = vmatmul.msk.f32.vlgmr.msra.gmra.mxu2 %vm315_vm10, %v1025_v56 }
 0x96d   :  { %1875 = vmatmul.msk.f32.gmra.mxu1 %vm315_vm10, %v1057_v57 }
 0x973   :  { %1879 = vmatmul.msk.f32.gmra.mxu2 %vm315_vm10, %v1028_v0 }
 0x975   :  { %1876 = vmatmul.msk.f32.gmra.mxu1 %vm315_vm10, %v1060_v51 }
 0x97b   :  { %1880 = vmatmul.msk.f32.gmra.mxu2 %vm315_vm10, %v1031_v1 }
 0x97d   :  { %1877 = vmatmul.msk.f32.gmra.mxu1 %vm315_vm10, %v1063_v2 }
 0x983   :  { %1881 = vmatmul.msk.f32.gmra.mxu2 %vm315_vm10, %v1034_v3 }
 0x9c2   :  { %v1095_v4 = vpop.f32.mrf.mxu1 }
 0x9c8   :  { %v1165_v5 = vpop.f32.mrf.mxu3  ;;  %v1194_v10 = vpop.f32.mrf.mxu0 }
 0x9c9   :  { %v1195_v54 = vadd.f32 %v1194_v10, %v1165_v5 }
 0x9ca   :  { %v1098_v11 = vpop.f32.mrf.mxu1 }
 0x9ce   :  { %v1136_v47 = vpop.f32.mrf.mxu2 }
 0x9cf   :  { %v1137_v58 = vadd.f32 %v1136_v47, %v1095_v4 }
 0x9d0   :  { %v1168_v12 = vpop.f32.mrf.mxu3  ;;  %v1197_v13 = vpop.f32.mrf.mxu0 }
 0x9d1   :  { %v1198_v53 = vadd.f32 %v1197_v13, %v1168_v12 }
 0x9d2   :  { %v1101_v14 = vpop.f32.mrf.mxu1 }
 0x9d6   :  { %v1139_v15 = vpop.f32.mrf.mxu2 }
 0x9d7   :  { %v1140_v60 = vadd.f32 %v1139_v15, %v1098_v11 }
 0x9d8   :  { %v1171_v17 = vpop.f32.mrf.mxu3  ;;  %v1200_v18 = vpop.f32.mrf.mxu0 }
 0x9d9   :  { %v1201_v34 = vadd.f32 %v1200_v18, %v1171_v17 }
 0x9da   :  { %v1104_v23 = vpop.f32.mrf.mxu1 }
 0x9de   :  { %v1142_v25 = vpop.f32.mrf.mxu2 }
 0x9df   :  { %v1143_v62 = vadd.f32 %v1142_v25, %v1101_v14 }
 0x9e0   :  { %v1174_v26 = vpop.f32.mrf.mxu3  ;;  %v1203_v27 = vpop.f32.mrf.mxu0 }
 0x9e1   :  { %v1204_v30 = vadd.f32 %v1203_v27, %v1174_v26 }
 0x9e2   :  { %v1223_v35 = vpop.f32.mrf.mxu1 }
 0x9e3   :  { %1882 = vmatpush.xpose.msk.msra.mxu3 %vm232_vm9, %v1204_v30 }
 0x9e6   :  { %v1145_v32 = vpop.f32.mrf.mxu2 }
 0x9e7   :  { %1883 = vmatpush.xpose.msk.msra.mxu3 %vm232_vm9, %v1201_v34  ;;  %v1146_v28 = vadd.f32 %v1145_v32, %v1104_v23 }
 0x9ea   :  { %v1226_v36 = vpop.f32.mrf.mxu1 }
 0x9eb   :  { %1884 = vmatpush.xpose.msk.msra.mxu3 %vm232_vm9, %v1198_v53 }
 0x9ee   :  { %v1252_v16 = vpop.f32.mrf.mxu2 }
 0x9ef   :  { %1885 = vmatpush.xpose.msk.msra.mxu3 %vm232_vm9, %v1195_v54  ;;  %v1253_v45 = vadd.f32 %v1252_v16, %v1223_v35  ;;  %v988_v54 = vld [vmem:[#allocation6 + $0x298] sm:$0xff]  ;;  %v986_v16 = vld [vmem:[#allocation6 + $0x288] sm:$0xff] }
 0x9f0   :  { %1457 = vmatpush.msrb.mxu2 %v988_v54  ;;  %1428 = vmatpush.msra.mxu1 %v986_v16  ;;  %v989_v54 = vld [vmem:[#allocation6 + $0x2a0] sm:$0xff] }
 0x9f2   :  { %1886 = vmatmul.msk.f32.vlgmr.msra.gmra.mxu3 %vm232_vm9, %v1137_v58  ;;  %v1229_v39 = vpop.f32.mrf.mxu1 }
 0x9f6   :  { %v1255_v59 = vpop.f32.mrf.mxu2 }
 0x9f7   :  { %v1256_v44 = vadd.f32 %v1255_v59, %v1226_v36 }
 0x9fa   :  { %1887 = vmatmul.msk.f32.gmra.mxu3 %vm232_vm9, %v1140_v60  ;;  %v1232_v63 = vpop.f32.mrf.mxu1 }
 0x9fe   :  { %v1258_v61 = vpop.f32.mrf.mxu2 }
 0x9ff   :  { %v1259_v42 = vadd.f32 %v1258_v61, %v1229_v39 }
 0xa02   :  { %1888 = vmatmul.msk.f32.gmra.mxu3 %vm232_vm9, %v1143_v62 }
 0xa06   :  { %v1261_v40 = vpop.f32.mrf.mxu2 }
 0xa07   :  { %v1262_v41 = vadd.f32 %v1261_v40, %v1232_v63 }
 0xa09   :  { %1385 = vmatpush.msra.mxu0 %v1262_v41 }
 0xa0a   :  { %1889 = vmatmul.msk.f32.gmra.mxu3 %vm232_vm9, %v1146_v28 }
 0xa0b   :  { %1386 = vmatpush.msra.mxu0 %v1259_v42  ;;  %v985_v42 = vld [vmem:[#allocation6 + $0x280] sm:$0xff] }
 0xa0c   :  { %1429 = vmatpush.msra.mxu1 %v985_v42 }
 0xa0d   :  { %1387 = vmatpush.msra.mxu0 %v1256_v44  ;;  %v987_v44 = vld [vmem:[#allocation6 + $0x290] sm:$0xff] }
 0xa0e   :  { %1458 = vmatpush.msrb.mxu2 %v987_v44 }
 0xa0f   :  { %1388 = vmatpush.msra.mxu0 %v1253_v45 }
 0xa75   :  { %v1305_v48 = vpop.f32.mrf.mxu3 }
 0xa76   :  { %v1306_v55 = vadd.f32 %v1305_v48, %v2241_v33 }
 0xa78   :  { %v1317_v56 = vsel %vm315_vm10, %v1306_v55, -inf }
 0xa79   :  { %1318 = vmax.xlane.f32.xlu2 %v1317_v56 }
 0xa7d   :  { %v1308_v57 = vpop.f32.mrf.mxu3 }
 0xa7e   :  { %v1309_v0 = vadd.f32 %v1308_v57, %v2245_v38 }
 0xa80   :  { %v1320_v51 = vsel %vm315_vm10, %v1309_v0, -inf }
 0xa81   :  { %1321 = vmax.xlane.f32.xlu0 %v1320_v51 }
 0xa85   :  { %v1311_v1 = vpop.f32.mrf.mxu3 }
 0xa86   :  { %v1312_v2 = vadd.f32 %v1311_v1, %v2249_v43 }
 0xa88   :  { %v1323_v3 = vsel %vm315_vm10, %v1312_v2, -inf }
 0xa89   :  { %1324 = vmax.xlane.f32.xlu1 %v1323_v3 }
 0xa8d   :  { %v1314_v4 = vpop.f32.mrf.mxu3 }
 0xa8e   :  { %v1315_v5 = vadd.f32 %v1314_v4, %v2253_v50 }
 0xa90   :  { %v1326_v33 = vsel %vm315_vm10, %v1315_v5, -inf }
 0xa91   :  { %1327 = vmax.xlane.f32.xlu2 %v1326_v33 }
 0xaec   :  { %v1319_v10 = vpop.xlane.xlu2 %1318 }
 0xaed   :  { %v1329_v11 = vsub.f32 %v1306_v55, %v1319_v10  ;;  %v1938_v10 = vld [vmem:[#allocation7 + $0xa8] ss:$0 sm:$0xff] }
 0xaef   :  { %v1333_v47 = vmul.f32 1.442695, %v1329_v11 }
 0xaf1   :  { %1972 = vpow2.f32 %v1333_v47 }
 0xaf4   :  { %v1322_v38 = vpop.xlane.xlu0 %1321 }
 0xaf5   :  { %v1330_v12 = vsub.f32 %v1309_v0, %v1322_v38 }
 0xaf7   :  { %v1973_v13 = vpop.eup %1972  ;;  %v1335_v14 = vmul.f32 1.442695, %v1330_v12 }
 0xaf8   :  { %v1341_v15 = vsel %vm315_vm10, %v1973_v13, 0.0 }
 0xaf9   :  { %1974 = vpow2.f32 %v1335_v14  ;;  %1342 = vadd.xlane.f32.xlu0 %v1341_v15 }
 0xafc   :  { %v1325_v43 = vpop.xlane.xlu1 %1324 }
 0xafd   :  { %v1331_v17 = vsub.f32 %v1312_v2, %v1325_v43 }
 0xaff   :  { %v1975_v18 = vpop.eup %1974  ;;  %v1337_v23 = vmul.f32 1.442695, %v1331_v17 }
 0xb00   :  { %v1344_v50 = vsel %vm315_vm10, %v1975_v18, 0.0 }
 0xb01   :  { %1976 = vpow2.f32 %v1337_v23  ;;  %1345 = vadd.xlane.f32.xlu1 %v1344_v50 }
 0xb04   :  { %v1328_v25 = vpop.xlane.xlu2 %1327 }
 0xb05   :  { %v1332_v26 = vsub.f32 %v1315_v5, %v1328_v25 }
 0xb07   :  { %v1977_v27 = vpop.eup %1976  ;;  %v1339_v30 = vmul.f32 1.442695, %v1332_v26 }
 0xb08   :  { %v1347_v34 = vsel %vm315_vm10, %v1977_v27, 0.0 }
 0xb09   :  { %1978 = vpow2.f32 %v1339_v30  ;;  %1348 = vadd.xlane.f32.xlu2 %v1347_v34 }
 0xb0f   :  { %v1979_v32 = vpop.eup %1978 }
 0xb10   :  { %v1350_v35 = vsel %vm315_vm10, %v1979_v32, 0.0 }
 0xb11   :  { %1351 = vadd.xlane.f32.xlu0 %v1350_v35  ;;  %v991_v35 = vld [vmem:[#allocation6 + $0x2b0] sm:$0xff] }
 0xb6c   :  { %v1343_v53 = vpop.xlane.xlu0 %1342 }
 0xb6d   :  { %1980 = vrcp.f32 %v1343_v53  ;;  %v990_v53 = vld [vmem:[#allocation6 + $0x2a8] sm:$0xff] }
 0xb73   :  { %v1981_v58 = vpop.eup %1980 }
 0xb74   :  { %v1357_v36 = vmul.f32 %v1981_v58, %v1973_v13  ;;  %v1346_v59 = vpop.xlane.xlu1 %1345 }
 0xb75   :  { %1982 = vrcp.f32 %v1346_v59  ;;  %v1000_v59 = vld [vmem:[#allocation6 + $0x2f8] sm:$0xff] }
 0xb76   :  { %1890 = vmatmul.msk.f32.vlgmr.msra.gmra.mxu0 %vm315_vm10, %v1357_v36  ;;  %1622 = vmatpush.msra.mxu2 %v1000_v59 }
 0xb7b   :  { %v1983_v60 = vpop.eup %1982 }
 0xb7c   :  { %v1349_v39 = vpop.xlane.xlu2 %1348  ;;  %v1358_v61 = vmul.f32 %v1983_v60, %v1975_v18  ;;  %v999_v60 = vld [vmem:[#allocation6 + $0x2f0] sm:$0xff] }
 0xb7d   :  { %1984 = vrcp.f32 %v1349_v39  ;;  %v998_v39 = vld [vmem:[#allocation6 + $0x2e8] sm:$0xff]  ;;  %1623 = vmatpush.msra.mxu2 %v999_v60 }
 0xb7e   :  { %1891 = vmatmul.msk.f32.gmra.mxu0 %vm315_vm10, %v1358_v61 }
 0xb7f   :  { %1624 = vmatpush.msra.mxu2 %v998_v39 }
 0xb83   :  { %v1985_v62 = vpop.eup %1984 }
 0xb84   :  { %v1352_v63 = vpop.xlane.xlu0 %1351  ;;  %v1359_v40 = vmul.f32 %v1985_v62, %v1977_v27 }
 0xb85   :  { %1986 = vrcp.f32 %v1352_v63  ;;  %v997_v63 = vld [vmem:[#allocation6 + $0x2e0] sm:$0xff] }
 0xb86   :  { %1892 = vmatmul.msk.f32.gmra.mxu0 %vm315_vm10, %v1359_v40  ;;  %1625 = vmatpush.msra.mxu2 %v997_v63  ;;  %v1693_v63 = vld [vmem:[#allocation6 + $0x310] sm:$0xff] }
 0xb8b   :  { %v1987_v41 = vpop.eup %1986 }
 0xb8c   :  { %v1360_v28 = vmul.f32 %v1987_v41, %v1979_v32  ;;  %v992_v32 = vld [vmem:[#allocation6 + $0x2b8] sm:$0xff] }
 0xb8d   :  { %1594 = vmatpush.msrb.mxu1 %v992_v32 }
 0xb8e   :  { %1893 = vmatmul.msk.f32.gmra.mxu0 %vm315_vm10, %v1360_v28  ;;  %v996_v28 = vld [vmem:[#allocation6 + $0x2d8] sm:$0xff] }
 0xb8f   :  { %1595 = vmatpush.msrb.mxu1 %v991_v35  ;;  %1626 = vmatpush.msra.mxu2 %v996_v28 }
 0xb91   :  { %1596 = vmatpush.msrb.mxu1 %v990_v53 }
 0xb93   :  { %1597 = vmatpush.msrb.mxu1 %v989_v54 }
 0xbf3   :  { %v1390_v45 = vpop.f32.mrf.mxu0 }
 0xbf4   :  { %1894 = vmatmul.msk.f32.vlgmr.msra.gmra.mxu1 %vm232_vm9, %v1390_v45  ;;  %1898 = vmatmul.msk.f32.vlgmr.msrb.gmra.mxu2 %vm232_vm9, %v1390_v45 }
 0xbfb   :  { %v1393_v48 = vpop.f32.mrf.mxu0 }
 0xbfc   :  { %1895 = vmatmul.msk.f32.gmra.mxu1 %vm232_vm9, %v1393_v48  ;;  %1899 = vmatmul.msk.f32.gmra.mxu2 %vm232_vm9, %v1393_v48 }
 0xc03   :  { %v1396_v55 = vpop.f32.mrf.mxu0 }
 0xc04   :  { %1896 = vmatmul.msk.f32.gmra.mxu1 %vm232_vm9, %v1396_v55  ;;  %1900 = vmatmul.msk.f32.gmra.mxu2 %vm232_vm9, %v1396_v55 }
 0xc0b   :  { %v1399_v56 = vpop.f32.mrf.mxu0 }
 0xc0c   :  { %1897 = vmatmul.msk.f32.gmra.mxu1 %vm232_vm9, %v1399_v56  ;;  %1901 = vmatmul.msk.f32.gmra.mxu2 %vm232_vm9, %v1399_v56 }
 0xc71   :  { %v1431_v57 = vpop.f32.mrf.mxu1 }
 0xc77   :  { %v1460_v0 = vpop.f32.mrf.mxu2 }
 0xc79   :  { %v1434_v51 = vpop.f32.mrf.mxu1 }
 0xc7f   :  { %v1463_v1 = vpop.f32.mrf.mxu2 }
 0xc81   :  { %v1437_v2 = vpop.f32.mrf.mxu1 }
 0xc87   :  { %v1466_v3 = vpop.f32.mrf.mxu2 }
 0xc89   :  { %v1440_v4 = vpop.f32.mrf.mxu1 }
 0xc8a   :  { %1507 = vmatpush.msrb.mxu0 %v1440_v4 }
 0xc8c   :  { %1508 = vmatpush.msrb.mxu0 %v1437_v2  ;;  %v1940_v2 = vld [vmem:[#allocation7 + $0xb8] ss:$0 sm:$0xff] }
 0xc8e   :  { %1509 = vmatpush.msrb.mxu0 %v1434_v51 }
 0xc8f   :  { %v1469_v5 = vpop.f32.mrf.mxu2 }
 0xc90   :  { %1484 = vmatpush.msrb.mxu3 %v1469_v5  ;;  %1510 = vmatpush.msrb.mxu0 %v1431_v57 }
 0xc91   :  { %1904 = vmatmul.msk.f32.vlgmr.msrb.gmra.mxu0 %vm315_vm10, %v2275_v7 }
 0xc92   :  { %1485 = vmatpush.msrb.mxu3 %v1466_v3 }
 0xc94   :  { %1486 = vmatpush.msrb.mxu3 %v1463_v1 }
 0xc96   :  { %1487 = vmatpush.msrb.mxu3 %v1460_v0  ;;  %v1939_v0 = vld [vmem:[#allocation7 + $0xb0] ss:$0 sm:$0xff] }
 0xc97   :  { %1902 = vmatmul.msk.f32.vlgmr.msrb.gmra.mxu3 %vm315_vm10, %v2273_v6 }
 0xc99   :  { %1905 = vmatmul.msk.f32.gmra.mxu0 %vm315_vm10, %v2283_v9 }
 0xc9f   :  { %1903 = vmatmul.msk.f32.gmra.mxu3 %vm315_vm10, %v2281_v8 }
 0xd0e   :  { %v1512_v33 = vpop.f32.mrf.mxu0 }
 0xd16   :  { %v1515_v7 = vpop.f32.mrf.mxu0 }
 0xd1a   :  { %v1489_v11 = vpop.f32.mrf.mxu3 }
 0xd1b   :  { %v1513_v47 = vadd.f32 %v1512_v33, %v1489_v11 }
 0xd1d   :  { %v1519_v38 = vadd.f32 %v1938_v10, %v1513_v47 }
 0xd1f   :  { %v1521_v12 = vmul.f32 %v2163_v49, %v1519_v38 }
 0xd21   :  { %v2417_v13 = vadd.f32 %v1521_v12, %v2331_v52 }
 0xd22   :  { %v1492_v14 = vpop.f32.mrf.mxu3 }
 0xd23   :  { %v1516_v15 = vadd.f32 %v1515_v7, %v1492_v14  ;;  %v1525_v6 = vsel %vm315_vm10, %v2417_v13, 0.0  ;;  %v995_v14 = vld [vmem:[#allocation6 + $0x2d0] sm:$0xff] }
 0xd24   :  { %1526 = vadd.xlane.f32.xlu1 %v1525_v6  ;;  %1627 = vmatpush.msra.mxu2 %v995_v14  ;;  %v993_v6 = vld [vmem:[#allocation6 + $0x2c0] sm:$0xff] }
 0xd25   :  { %v1520_v9 = vadd.f32 %v1938_v10, %v1516_v15  ;;  %v994_v15 = vld [vmem:[#allocation6 + $0x2c8] sm:$0xff] }
 0xd26   :  { %1628 = vmatpush.msra.mxu2 %v994_v15 }
 0xd27   :  { %v1522_v8 = vmul.f32 %v2161_v46, %v1520_v9  ;;  %v1941_v9 = vld [vmem:[#allocation7 + $0xc0] ss:$0 sm:$0xff] }
 0xd28   :  { %1629 = vmatpush.msra.mxu2 %v993_v6 }
 0xd29   :  { %v2423_v43 = vadd.f32 %v1522_v8, %v2327_v29 }
 0xd2b   :  { %v1528_v17 = vsel %vm315_vm10, %v2423_v43, 0.0 }
 0xd2c   :  { %1529 = vadd.xlane.f32.xlu2 %v1528_v17 }
 0xd97   :  { %v1527_v18 = vpop.xlane.xlu1 %1526 }
 0xd98   :  { %v1531_v52 = vmul.f32 %v1527_v18, %v2301_v37 }
 0xd9a   :  { %v1533_v23 = vsub.f32 %v2417_v13, %v1531_v52 }
 0xd9c   :  { %v1535_v50 = vmul.f32 %v1533_v23, %v1533_v23 }
 0xd9e   :  { %v1537_v25 = vsel %vm315_vm10, %v1535_v50, 0.0 }
 0xd9f   :  { %v1530_v26 = vpop.xlane.xlu2 %1529  ;;  %1538 = vadd.xlane.f32.xlu0 %v1537_v25  ;;  %v1942_v25 = vld [vmem:[#allocation7 + $0xc8] ss:$0 sm:$0xff] }
 0xda0   :  { %v1532_v27 = vmul.f32 %v1530_v26, %v2301_v37 }
 0xda2   :  { %v1534_v30 = vsub.f32 %v2423_v43, %v1532_v27 }
 0xda4   :  { %v1536_v29 = vmul.f32 %v1534_v30, %v1534_v30 }
 0xda6   :  { %v1540_v34 = vsel %vm315_vm10, %v1536_v29, 0.0 }
 0xda7   :  { %1541 = vadd.xlane.f32.xlu1 %v1540_v34 }
 0xe12   :  { %v1539_v16 = vpop.xlane.xlu0 %1538 }
 0xe13   :  { %v1543_v58 = vmul.f32 %v1539_v16, %v2301_v37 }
 0xe15   :  { %v1545_v36 = vadd.f32 1e-05, %v1543_v58 }
 0xe17   :  { %1988 = vrsqrt.f32 %v1545_v36  ;;  %vm1553_vm1 = vweird.f32 %v1545_v36 }
 0xe1a   :  { %v1542_v61 = vpop.xlane.xlu1 %1541 }
 0xe1b   :  { %v1544_v62 = vmul.f32 %v1542_v61, %v2301_v37 }
 0xe1d   :  { %v1989_v40 = vpop.eup %1988  ;;  %v1546_v41 = vadd.f32 1e-05, %v1544_v62 }
 0xe1e   :  { %v1548_v42 = vmul.f32 %v1989_v40, %v1545_v36  ;;  %vm1554_vm15 = vweird.f32 %v1989_v40 }
 0xe1f   :  { %1990 = vrsqrt.f32 %v1546_v41  ;;  %vm1555_vm2 = vmor %vm1553_vm1, %vm1554_vm15  ;;  %vm1563_vm4 = vweird.f32 %v1546_v41 }
 0xe20   :  { %v1549_v44 = vmul.f32 %v1989_v40, %v1548_v42 }
 0xe22   :  { %v1550_v45 = vmul.f32 0.5, %v1549_v44 }
 0xe24   :  { %v1551_v48 = vsub.f32 1.5, %v1550_v45 }
 0xe25   :  { %v1991_v55 = vpop.eup %1990 }
 0xe26   :  { %v1552_v56 = vmul.f32 %v1989_v40, %v1551_v48  ;;  %v1558_v57 = vmul.f32 %v1991_v55, %v1546_v41  ;;  %vm1564_vm3 = vweird.f32 %v1991_v55  ;;  %v1691_v41 = vld [vmem:[#allocation6 + $0x300] sm:$0xff] }
 0xe27   :  { %vm1565_vm5 = vmor %vm1563_vm4, %vm1564_vm3 }
 0xe28   :  { %v1556_v51 = vsel %vm1555_vm2, %v1989_v40, %v1552_v56  ;;  %v1559_v1 = vmul.f32 %v1991_v55, %v1558_v57  ;;  %v1692_v40 = vld [vmem:[#allocation6 + $0x308] sm:$0xff] }
 0xe29   :  { %v1567_v3 = vmul.f32 %v1556_v51, %v1533_v23 }
 0xe2a   :  { %v1560_v4 = vmul.f32 0.5, %v1559_v1 }
 0xe2b   :  { %v1570_v5 = vmul.f32 %v1939_v0, %v1567_v3 }
 0xe2c   :  { %v1561_v33 = vsub.f32 1.5, %v1560_v4 }
 0xe2d   :  { %v1573_v10 = vadd.f32 %v1940_v2, %v1570_v5  ;;  %v1943_v5 = vld [vmem:[#allocation7 + $0xd0] ss:$0 sm:$0xff] }
 0xe2e   :  { %v1562_v11 = vmul.f32 %v1991_v55, %v1561_v33 }
 0xe2f   :  { %1906 = vmatmul.msk.f32.vlgmr.msrb.gmra.mxu1 %vm315_vm10, %v1573_v10 }
 0xe30   :  { %v1566_v47 = vsel %vm1565_vm5, %v1991_v55, %v1562_v11  ;;  %v1944_v11 = vld [vmem:[#allocation7 + $0xd8] ss:$0 sm:$0xff] }
 0xe31   :  { %v1568_v38 = vmul.f32 %v1566_v47, %v1534_v30 }
 0xe33   :  { %v1571_v12 = vmul.f32 %v1939_v0, %v1568_v38 }
 0xe35   :  { %v1574_v7 = vadd.f32 %v1940_v2, %v1571_v12 }
 0xe37   :  { %1907 = vmatmul.msk.f32.gmra.mxu1 %vm315_vm10, %v1574_v7 }
 0xeac   :  { %v1599_v8 = vpop.f32.mrf.mxu1 }
 0xead   :  { %v1600_v17 = vadd.f32 %v1941_v9, %v1599_v8 }
 0xeaf   :  { %v1605_v18 = vmax.f32 %v1600_v17, 0.0  ;;  %v1734_v17 = vsel %vm1733_vm14, %v2157_v31, %v1732_v24 }
 0xeb1   :  { %1908 = vmatmul.msk.f32.vlgmr.msra.gmra.mxu2 %vm877_vm6, %v1605_v18 }
 0xeb4   :  { %v1602_v52 = vpop.f32.mrf.mxu1 }
 0xeb5   :  { %v1603_v23 = vadd.f32 %v1941_v9, %v1602_v52 }
 0xeb7   :  { %v1606_v50 = vmax.f32 %v1603_v23, 0.0  ;;  %v1727_v23 = vld [vmem:[#allocation7 + $0x68] sm:$0x3] }
 0xeb9   :  { %1909 = vmatmul.msk.f32.gmra.mxu2 %vm877_vm6, %v1606_v50  ;;  %v1726_v50 = vld [vmem:[#allocation7 + $0x60] sm:$0x3] }
 0xeba   :  { %vm1736_vm15 = vcmp.lt.f32.partialorder %v1726_v50, %v1734_v17 }
 0xf34   :  { %v1631_v26 = vpop.f32.mrf.mxu2 }
 0xf35   :  { %v1632_v27 = vadd.f32 %v1942_v25, %v1631_v26 }
 0xf37   :  { %v1637_v30 = vmul.f32 %v2163_v49, %v1632_v27 }
 0xf39   :  { %v1639_v29 = vadd.f32 %v1637_v30, %v2417_v13 }
 0xf3b   :  { %v1641_v34 = vsel %vm315_vm10, %v1639_v29, 0.0 }
 0xf3c   :  { %1642 = vadd.xlane.f32.xlu2 %v1641_v34  ;;  %v1634_v32 = vpop.f32.mrf.mxu2 }
 0xf3d   :  { %v1635_v35 = vadd.f32 %v1942_v25, %v1634_v32  ;;  %v1945_v25 = vld [vmem:[#allocation7 + $0xe0] ss:$0 sm:$0xff] }
 0xf3f   :  { %v1638_v53 = vmul.f32 %v2161_v46, %v1635_v35 }
 0xf41   :  { %v1640_v54 = vadd.f32 %v1638_v53, %v2423_v43  ;;  %v1694_v43 = vld [vmem:[#allocation6 + $0x318] sm:$0xff] }
 0xf42   :  { %1715 = vmatpush.msra.mxu3 %v1694_v43 }
 0xf43   :  { %v1644_v16 = vsel %vm315_vm10, %v1640_v54, 0.0 }
 0xf44   :  { %1645 = vadd.xlane.f32.xlu0 %v1644_v16  ;;  %1716 = vmatpush.msra.mxu3 %v1693_v63 }
 0xf46   :  { %1717 = vmatpush.msra.mxu3 %v1692_v40 }
 0xf48   :  { %1718 = vmatpush.msra.mxu3 %v1691_v41 }
 0xfaf   :  { %v1643_v58 = vpop.xlane.xlu2 %1642 }
 0xfb0   :  { %v1647_v36 = vmul.f32 %v1643_v58, %v2301_v37 }
 0xfb2   :  { %v1649_v59 = vsub.f32 %v1639_v29, %v1647_v36 }
 0xfb4   :  { %v1651_v60 = vmul.f32 %v1649_v59, %v1649_v59 }
 0xfb6   :  { %v1653_v49 = vsel %vm315_vm10, %v1651_v60, 0.0 }
 0xfb7   :  { %1654 = vadd.xlane.f32.xlu1 %v1653_v49  ;;  %v1646_v13 = vpop.xlane.xlu0 %1645 }
 0xfb8   :  { %v1648_v39 = vmul.f32 %v1646_v13, %v2301_v37 }
 0xfba   :  { %v1650_v61 = vsub.f32 %v1640_v54, %v1648_v39 }
 0xfbc   :  { %v1652_v62 = vmul.f32 %v1650_v61, %v1650_v61 }
 0xfbe   :  { %v1656_v46 = vsel %vm315_vm10, %v1652_v62, 0.0 }
 0xfbf   :  { %1657 = vadd.xlane.f32.xlu2 %v1656_v46 }
0x102a   :  { %v1655_v28 = vpop.xlane.xlu1 %1654 }
0x102b   :  { %v1659_v42 = vmul.f32 %v1655_v28, %v2301_v37 }
0x102d   :  { %v1661_v44 = vadd.f32 1e-05, %v1659_v42 }
0x102f   :  { %1992 = vrsqrt.f32 %v1661_v44  ;;  %vm1669_vm7 = vweird.f32 %v1661_v44 }
0x1032   :  { %v1658_v45 = vpop.xlane.xlu2 %1657 }
0x1033   :  { %v1660_v48 = vmul.f32 %v1658_v45, %v2301_v37 }
0x1035   :  { %v1993_v55 = vpop.eup %1992  ;;  %v1662_v56 = vadd.f32 1e-05, %v1660_v48 }
0x1036   :  { %v1664_v57 = vmul.f32 %v1993_v55, %v1661_v44  ;;  %vm1670_vm6 = vweird.f32 %v1993_v55 }
0x1037   :  { %1994 = vrsqrt.f32 %v1662_v56  ;;  %vm1671_vm8 = vmor %vm1669_vm7, %vm1670_vm6  ;;  %vm1679_vm12 = vweird.f32 %v1662_v56 }
0x1038   :  { %v1665_v0 = vmul.f32 %v1993_v55, %v1664_v57  ;;  %1996 = vrcp.f32 %v1734_v17 }
0x103a   :  { %v1666_v51 = vmul.f32 0.5, %v1665_v0 }
0x103c   :  { %v1667_v1 = vsub.f32 1.5, %v1666_v51 }
0x103d   :  { %v1995_v2 = vpop.eup %1994 }
0x103e   :  { %v1668_v3 = vmul.f32 %v1993_v55, %v1667_v1  ;;  %v1674_v4 = vmul.f32 %v1995_v2, %v1662_v56  ;;  %vm1680_vm11 = vweird.f32 %v1995_v2  ;;  %v1997_v52 = vpop.eup %1996 }
0x103f   :  { %vm1681_vm13 = vmor %vm1679_vm12, %vm1680_vm11  ;;  %v1737_v26 = vmul.f32 %v1997_v52, %v1727_v23 }
0x1040   :  { %v1672_v33 = vsel %vm1671_vm8, %v1993_v55, %v1668_v3  ;;  %v1675_v10 = vmul.f32 %v1995_v2, %v1674_v4 }
0x1041   :  { %v1683_v47 = vmul.f32 %v1672_v33, %v1649_v59  ;;  %v1738_v19 = vsel %vm1736_vm15, %v1737_v26, 0.0 }
0x1042   :  { %v1676_v38 = vmul.f32 0.5, %v1675_v10 }
0x1043   :  { %v1686_v37 = vmul.f32 %v1943_v5, %v1683_v47 }
0x1044   :  { %v1677_v12 = vsub.f32 1.5, %v1676_v38 }
0x1045   :  { %v1689_v7 = vadd.f32 %v1944_v11, %v1686_v37 }
0x1046   :  { %v1678_v14 = vmul.f32 %v1995_v2, %v1677_v12 }
0x1047   :  { %1910 = vmatmul.msk.f32.vlgmr.msra.gmra.mxu3 %vm315_vm10, %v1689_v7 }
0x1048   :  { %v1682_v15 = vsel %vm1681_vm13, %v1995_v2, %v1678_v14 }
0x1049   :  { %v1684_v6 = vmul.f32 %v1682_v15, %v1650_v61 }
0x104b   :  { %v1687_v9 = vmul.f32 %v1943_v5, %v1684_v6 }
0x104d   :  { %v1690_v8 = vadd.f32 %v1944_v11, %v1687_v9 }
0x104f   :  { %1911 = vmatmul.msk.f32.gmra.mxu3 %vm315_vm10, %v1690_v8 }
0x10ca   :  { %v1720_v18 = vpop.f32.mrf.mxu3 }
0x10cb   :  { %v1721_v29 = vadd.f32 %v1945_v25, %v1720_v18 }
0x10d2   :  { %v1723_v27 = vpop.f32.mrf.mxu3 }
0x10d3   :  { %v1724_v30 = vadd.f32 %v1945_v25, %v1723_v27 }
0x10d5   :  { %1756 = vmatpush.msra.mxu0 %v1724_v30 }
0x10d7   :  { %1757 = vmatpush.msra.mxu0 %v1721_v29 }
0x10d8   :  { %1912 = vmatmul.msk.f32.vlgmr.msra.gmra.mxu0 %vm232_vm9, %v1738_v19 }
0x1155   :  { %v1759_v20 = vpop.f32.mrf.mxu0 }
0x1156   :  { %1763 = vst.msk [vmem:[#allocation9] sm:$0x3] %vm1762_vm0, %v1759_v20 }
0x1157   :  { %1774 = dma.vmem_to_hbm [thread:$0]  %s1770_s10, 32, %s1772_s13, [#allocation4]  }
0x1158   :  { %2088 = dma.done.wait [#allocation4], 32  }
0x1159   :  { %2089 = vsyncadd [#allocation4], 4294967264 }
0x115a   :  { %1779 = vsyncpa [#allocation3], 1 }
0x115b   :  { %1780 = vsyncpa [#allocation8], 1 }
0x115c   :  { %1781 = vsyncpa [#allocation4], 1 }
0x115d   :  { %1782 = vsyncpa [#allocation5], 1 }

</bundles_post_ra>
